<compile_context>
chip_gen: v7x
topology: tpu7x:2x2x1
jax: 0.10.0
libtpu: 0.0.40
codegen_flags: <defaults>
</compile_context>

<pallas_src>
import jax
import jax.numpy as jnp
from jax.experimental import pallas as pl
from jax.experimental.pallas import tpu as pltpu


def upconv_kernel(xm_ref, xh0_ref, xh1_ref, w_ref, scale_ref, shift_ref, o_ref, xpad_ref):
    # xm_ref:    (tH, Wp, Cin)     main rows of the zero-padded input tile (bf16)
    # xh0_ref:   (1,  Wp, Cin)     halo row  (t+1)*tH          (bf16)
    # xh1_ref:   (1,  Wp, Cin)     halo row  (t+1)*tH + 1      (bf16)
    # w_ref:     (3, 3, Cin, Cp)   phase-stacked weights (bf16), Cp = pad(4*Cout, 128)
    # scale_ref: (1, Cp)           folded BN scale   (f32)
    # shift_ref: (1, Cp)           folded bias+BN shift (f32)
    # o_ref:     (tH, W, Cp)       output tile (f32)
    # xpad_ref:  (tH+2, Wp, Cin)   VMEM scratch: assembled padded tile
    tH, Wp, Cin = xm_ref.shape
    W = Wp - 2
    Cp = o_ref.shape[-1]

    # Assemble main + halo rows into one (tH+2)-row padded tile (cheap VMEM copies).
    xpad_ref[0:tH] = xm_ref[...]
    xpad_ref[tH:tH + 1] = xh0_ref[...]
    xpad_ref[tH + 1:tH + 2] = xh1_ref[...]

    # 9 shifted MXU dots with f32 accumulation (K = Cin each); the per-dy row load is hoisted.
    acc = jnp.zeros((tH * W, Cp), jnp.float32)
    for dy in range(3):
        rows = xpad_ref[dy:dy + tH]                                   # (tH, Wp, Cin)
        for dx in range(3):
            patch = rows[:, dx:dx + W, :].reshape(tH * W, Cin)
            acc = acc + jnp.dot(patch, w_ref[dy, dx],
                                preferred_element_type=jnp.float32)

    # Folded conv-bias + eval BatchNorm, then ReLU — one f32 FMA + max per tile.
    y = acc * scale_ref[...] + shift_ref[...]
    y = jnp.maximum(y, 0.0)
    o_ref[...] = y.reshape(tH, W, Cp).astype(o_ref.dtype)


def _auto_tile_h(H, W, Cin, Cp, budget_bytes=12 * 1024 * 1024):
    """Largest divisor of H whose layout-padded VMEM footprint fits the budget."""
    Wp = W + 2
    cin_lane = ((Cin + 127) // 128) * 128          # lane padding of the last dim
    cin_sub = ((Cin + 15) // 16) * 16              # bf16 sublane pack (weights)
    wp_sub = ((Wp + 15) // 16) * 16                # bf16 sublane pack (input rows)
    w_sub = ((W + 7) // 8) * 8                     # f32 sublanes (output rows)

    def footprint(th):
        in_main = 2 * th * wp_sub * cin_lane * 2                 # double-buffered bf16 input
        in_halo = 2 * 2 * 16 * cin_lane * 2                      # two 1-row halos, dbuf
        scratch = (th + 2) * wp_sub * cin_lane * 2               # assembled padded tile
        weights = 2 * 9 * cin_sub * Cp * 2                       # (3,3,Cin,Cp) bf16
        epilog = 2 * 2 * 8 * Cp * 4                              # scale/shift
        out_buf = 2 * th * w_sub * Cp * 4                        # double-buffered f32 output
        live = th * w_sub * Cp * 4 + 2 * th * wp_sub * cin_lane * 4   # acc + patch temps
        return in_main + in_halo + scratch + weights + epilog + out_buf + live

    best = 1
    for th in range(1, H + 1):
        if H % th == 0 and footprint(th) <= budget_bytes:
            best = th
    return best


def upconv_forward(x_nchw, w_hwio, bias, gamma, beta, run_mean, run_var,
                   eps=1e-5, tile_h=None):
    """UpConv forward: (N, Cin, H, W) -> (N, Cout, 2H, 2W)."""
    N, Cin, H, W = x_nchw.shape
    Cout = w_hwio.shape[-1]
    C4 = 4 * Cout                              # phase-stacked output channels
    Cp = ((C4 + 127) // 128) * 128             # lane-dense store width

    if tile_h is not None and H % tile_h == 0:
        tH = tile_h
    else:
        tH = _auto_tile_h(H, W, Cin, Cp)
    nT = H // tH

    # --- glue: NCHW -> NHWC, 1-px zero pad, bf16 (one fused XLA pass; no 2x upsample). ---
    x = jnp.transpose(x_nchw, (0, 2, 3, 1))
    x = jnp.pad(x, ((0, 0), (1, 1), (1, 1), (0, 0))).astype(jnp.bfloat16)
    Wp = W + 2

    # --- phase-fold the 3x3 weights: conv3x3 o nearest_upsample2x == four phase convs at
    #     ORIGINAL resolution.  M[p, u, dy] mixes original tap dy into effective tap u for
    #     output phase p; the 4 phases are stacked on the output-channel axis. ---
    M = jnp.array([[[1., 0., 0.], [0., 1., 1.], [0., 0., 0.]],
                   [[0., 0., 0.], [1., 1., 0.], [0., 0., 1.]]], jnp.float32)
    w_big = jnp.einsum('pud,qve,deio->uvipqo', M, M, w_hwio.astype(jnp.float32))
    w_big = w_big.reshape(3, 3, Cin, C4)                        # (dy, dx, Cin, phase*Cout)
    w_p = jnp.pad(w_big, ((0, 0), (0, 0), (0, 0), (0, Cp - C4))).astype(jnp.bfloat16)

    # --- fold conv bias + eval-mode BatchNorm into per-channel scale/shift (f32). ---
    # TODO(synk): training-mode BatchNorm (batch stats + running-stat update) not implemented.
    scale = gamma / jnp.sqrt(run_var + eps)
    shift = (bias - run_mean) * scale + beta
    scale_p = jnp.pad(jnp.tile(scale, 4), (0, Cp - C4)).reshape(1, Cp).astype(jnp.float32)
    shift_p = jnp.pad(jnp.tile(shift, 4), (0, Cp - C4)).reshape(1, Cp).astype(jnp.float32)

    out_p = pl.pallas_call(
        upconv_kernel,
        out_shape=jax.ShapeDtypeStruct((N, H, W, Cp), jnp.float32),
        grid_spec=pltpu.PrefetchScalarGridSpec(
            num_scalar_prefetch=0,
            grid=(N, nT),
            in_specs=[
                # main rows [t*tH, (t+1)*tH) of the padded input
                pl.BlockSpec((pl.Squeezed(), tH, Wp, Cin),
                             lambda n, t: (n, t, 0, 0)),
                # halo rows (t+1)*tH and (t+1)*tH + 1 (block size 1 => element index)
                pl.BlockSpec((pl.Squeezed(), 1, Wp, Cin),
                             lambda n, t: (n, (t + 1) * tH, 0, 0)),
                pl.BlockSpec((pl.Squeezed(), 1, Wp, Cin),
                             lambda n, t: (n, (t + 1) * tH + 1, 0, 0)),
                pl.BlockSpec((3, 3, Cin, Cp), lambda n, t: (0, 0, 0, 0)),
                pl.BlockSpec((1, Cp), lambda n, t: (0, 0)),
                pl.BlockSpec((1, Cp), lambda n, t: (0, 0)),
            ],
            out_specs=pl.BlockSpec((pl.Squeezed(), tH, W, Cp),
                                   lambda n, t: (n, t, 0, 0)),
            scratch_shapes=[pltpu.VMEM((tH + 2, Wp, Cin), jnp.bfloat16)],
        ),
        compiler_params=pltpu.CompilerParams(
            dimension_semantics=("parallel", "parallel"),
            vmem_limit_bytes=32 * 1024 * 1024,
        ),
    )(x, x, x, w_p, scale_p, shift_p)

    # --- depth-to-space (pixel shuffle) + back to NCHW (fused by XLA into one transpose). ---
    out = out_p[..., :C4].reshape(N, H, W, 2, 2, Cout)       # (n, i, j, py, px, co)
    out = jnp.transpose(out, (0, 5, 1, 3, 2, 4))             # (n, co, i, py, j, px)
    return out.reshape(N, Cout, 2 * H, 2 * W)


def reference_forward(x_nchw, w_hwio, bias, gamma, beta, run_mean, run_var, eps=1e-5):
    """Pure-JAX f32 reference (eval-mode BatchNorm)."""
    xu = jnp.repeat(jnp.repeat(x_nchw, 2, axis=2), 2, axis=3)
    w_oihw = jnp.transpose(w_hwio, (3, 2, 0, 1))
    y = jax.lax.conv_general_dilated(
        xu, w_oihw, window_strides=(1, 1), padding=((1, 1), (1, 1)),
        dimension_numbers=("NCHW", "OIHW", "NCHW"))
    y = y + bias[None, :, None, None]
    y = (y - run_mean[None, :, None, None]) / jnp.sqrt(run_var[None, :, None, None] + eps)
    y = gamma[None, :, None, None] * y + beta[None, :, None, None]
    return jnp.maximum(y, 0.0)


if __name__ == "__main__":
    # Small shapes: batch=2, in_channels=8, out_channels=4, spatial 16 -> output spatial 32.
    N, Cin, Cout, H0, W0 = 2, 8, 4, 16, 16

    key = jax.random.PRNGKey(0)
    kw, kb, kg, kbt, km, kv, kx = jax.random.split(key, 7)

    # Deterministic synthetic params (nn.Conv2d(8,4,3,1,1,bias=True) + BatchNorm2d(4), eval).
    w_hwio = 0.1 * jax.random.normal(kw, (3, 3, Cin, Cout), jnp.float32)
    bias = 0.1 * jax.random.normal(kb, (Cout,), jnp.float32)
    gamma = 1.0 + 0.1 * jax.random.normal(kg, (Cout,), jnp.float32)
    beta = 0.1 * jax.random.normal(kbt, (Cout,), jnp.float32)
    run_mean = 0.1 * jax.random.normal(km, (Cout,), jnp.float32)
    run_var = 0.5 + jnp.abs(jax.random.normal(kv, (Cout,), jnp.float32))

    x = jax.random.normal(kx, (N, Cin, H0, W0), jnp.float32)

    ref = reference_forward(x, w_hwio, bias, gamma, beta, run_mean, run_var)

    # Exercise both the explicit multi-tile config and the auto-selected tile config.
    for th in (8, None):
        out = upconv_forward(x, w_hwio, bias, gamma, beta, run_mean, run_var, tile_h=th)
        out = jax.block_until_ready(out)
        assert out.shape == (N, Cout, 2 * H0, 2 * W0), out.shape

        # bf16 matmul inputs (f32 accumulation) => looser tolerance than a pure-f32 path.
        max_err = float(jnp.max(jnp.abs(out - ref)))
        mean_err = float(jnp.mean(jnp.abs(out - ref)))
        assert max_err < 1e-1, (th, max_err)
        assert mean_err < 2e-2, (th, mean_err)

    print("KERNEL_OK")
</pallas_src>

<mosaic_0001>
module attributes {stable_mosaic.version = 11 : i64} {
  func.func @upconv_kernel(%arg0: i32, %arg1: i32, %arg2: memref<1x8x18x8xbf16, #tpu.memory_space<vmem>>, %arg3: memref<1x1x18x8xbf16, #tpu.memory_space<vmem>>, %arg4: memref<1x1x18x8xbf16, #tpu.memory_space<vmem>>, %arg5: memref<3x3x8x128xbf16, #tpu.memory_space<vmem>>, %arg6: memref<1x128xf32, #tpu.memory_space<vmem>>, %arg7: memref<1x128xf32, #tpu.memory_space<vmem>>, %arg8: memref<1x8x16x128xf32, #tpu.memory_space<vmem>>, %arg9: memref<10x18x8xbf16, #tpu.memory_space<vmem>>) attributes {dimension_semantics = [#tpu.dimension_semantics<parallel>, #tpu.dimension_semantics<parallel>], iteration_bounds = array<i64: 2, 2>, scalar_prefetch = 0 : i64, scratch_operands = 1 : i64, tpu.core_type = #tpu.core_type<tc>, window_params = [{transform_indices = @transform_0, window_bounds = array<i64: 1, 8, 18, 8>}, {transform_indices = @transform_1, window_bounds = array<i64: 1, 1, 18, 8>}, {transform_indices = @transform_2, window_bounds = array<i64: 1, 1, 18, 8>}, {pipeline_mode = #tpu.pipeline_mode<synchronous>, transform_indices = @transform_3, window_bounds = array<i64: 3, 3, 8, 128>}, {pipeline_mode = #tpu.pipeline_mode<synchronous>, transform_indices = @transform_4, window_bounds = array<i64: 1, 128>}, {pipeline_mode = #tpu.pipeline_mode<synchronous>, transform_indices = @transform_5, window_bounds = array<i64: 1, 128>}, {transform_indices = @transform_6, window_bounds = array<i64: 1, 8, 16, 128>}]} {
    %c0 = arith.constant 0 : index
    %c0_0 = arith.constant 0 : index
    %c0_1 = arith.constant 0 : index
    %c0_2 = arith.constant 0 : index
    %0 = vector.load %arg2[%c0, %c0_0, %c0_1, %c0_2] : memref<1x8x18x8xbf16, #tpu.memory_space<vmem>>, vector<1x8x18x8xbf16>
    %1 = vector.shape_cast %0 : vector<1x8x18x8xbf16> to vector<8x18x8xbf16>
    %c0_3 = arith.constant 0 : index
    %c0_4 = arith.constant 0 : index
    %c0_5 = arith.constant 0 : index
    %2 = vector.load %arg9[%c0_3, %c0_4, %c0_5] : memref<10x18x8xbf16, #tpu.memory_space<vmem>>, vector<8x18x8xbf16>
    tpu.vector_store %arg9[%c0_3, %c0_4, %c0_5], %1 {strides = array<i32>} : memref<10x18x8xbf16, #tpu.memory_space<vmem>>, vector<8x18x8xbf16>,
    %c0_6 = arith.constant 0 : index
    %c0_7 = arith.constant 0 : index
    %c0_8 = arith.constant 0 : index
    %c0_9 = arith.constant 0 : index
    %3 = vector.load %arg3[%c0_6, %c0_7, %c0_8, %c0_9] : memref<1x1x18x8xbf16, #tpu.memory_space<vmem>>, vector<1x1x18x8xbf16>
    %4 = vector.shape_cast %3 : vector<1x1x18x8xbf16> to vector<1x18x8xbf16>
    %c8 = arith.constant 8 : index
    %c0_10 = arith.constant 0 : index
    %c0_11 = arith.constant 0 : index
    %5 = vector.load %arg9[%c8, %c0_10, %c0_11] : memref<10x18x8xbf16, #tpu.memory_space<vmem>>, vector<1x18x8xbf16>
    tpu.vector_store %arg9[%c8, %c0_10, %c0_11], %4 {strides = array<i32>} : memref<10x18x8xbf16, #tpu.memory_space<vmem>>, vector<1x18x8xbf16>,
    %c0_12 = arith.constant 0 : index
    %c0_13 = arith.constant 0 : index
    %c0_14 = arith.constant 0 : index
    %c0_15 = arith.constant 0 : index
    %6 = vector.load %arg4[%c0_12, %c0_13, %c0_14, %c0_15] : memref<1x1x18x8xbf16, #tpu.memory_space<vmem>>, vector<1x1x18x8xbf16>
    %7 = vector.shape_cast %6 : vector<1x1x18x8xbf16> to vector<1x18x8xbf16>
    %c9 = arith.constant 9 : index
    %c0_16 = arith.constant 0 : index
    %c0_17 = arith.constant 0 : index
    %8 = vector.load %arg9[%c9, %c0_16, %c0_17] : memref<10x18x8xbf16, #tpu.memory_space<vmem>>, vector<1x18x8xbf16>
    tpu.vector_store %arg9[%c9, %c0_16, %c0_17], %7 {strides = array<i32>} : memref<10x18x8xbf16, #tpu.memory_space<vmem>>, vector<1x18x8xbf16>,
    %cst = arith.constant 0.000000e+00 : f32
    %9 = vector.broadcast %cst : f32 to vector<128x128xf32>
    %c0_18 = arith.constant 0 : index
    %c0_19 = arith.constant 0 : index
    %c0_20 = arith.constant 0 : index
    %10 = vector.load %arg9[%c0_18, %c0_19, %c0_20] : memref<10x18x8xbf16, #tpu.memory_space<vmem>>, vector<8x18x8xbf16>
    %11 = vector.extract_strided_slice %10 {offsets = [0, 0, 0], sizes = [8, 16, 8], strides = [1, 1, 1]} : vector<8x18x8xbf16> to vector<8x16x8xbf16>
    %12 = vector.shape_cast %11 : vector<8x16x8xbf16> to vector<128x8xbf16>
    %c0_21 = arith.constant 0 : index
    %c0_22 = arith.constant 0 : index
    %c0_23 = arith.constant 0 : index
    %c0_24 = arith.constant 0 : index
    %13 = vector.load %arg5[%c0_21, %c0_22, %c0_23, %c0_24] : memref<3x3x8x128xbf16, #tpu.memory_space<vmem>>, vector<1x1x8x128xbf16>
    %14 = vector.shape_cast %13 : vector<1x1x8x128xbf16> to vector<8x128xbf16>
    %cst_25 = arith.constant dense<0.000000e+00> : vector<128x128xf32>
    %15 = tpu.matmul %12, %14, %cst_25 {dimension_numbers = #tpu.dot_dimension_numbers<[1], [0], [0], [1], [0, 0, 1, 1], [], []>} : vector<128x8xbf16>, vector<8x128xbf16>, vector<128x128xf32> -> vector<128x128xf32>
    %16 = arith.addf %9, %15 : vector<128x128xf32>
    %17 = vector.extract_strided_slice %10 {offsets = [0, 1, 0], sizes = [8, 16, 8], strides = [1, 1, 1]} : vector<8x18x8xbf16> to vector<8x16x8xbf16>
    %18 = vector.shape_cast %17 : vector<8x16x8xbf16> to vector<128x8xbf16>
    %c0_26 = arith.constant 0 : index
    %c1 = arith.constant 1 : index
    %c0_27 = arith.constant 0 : index
    %c0_28 = arith.constant 0 : index
    %19 = vector.load %arg5[%c0_26, %c1, %c0_27, %c0_28] : memref<3x3x8x128xbf16, #tpu.memory_space<vmem>>, vector<1x1x8x128xbf16>
    %20 = vector.shape_cast %19 : vector<1x1x8x128xbf16> to vector<8x128xbf16>
    %cst_29 = arith.constant dense<0.000000e+00> : vector<128x128xf32>
    %21 = tpu.matmul %18, %20, %cst_29 {dimension_numbers = #tpu.dot_dimension_numbers<[1], [0], [0], [1], [0, 0, 1, 1], [], []>} : vector<128x8xbf16>, vector<8x128xbf16>, vector<128x128xf32> -> vector<128x128xf32>
    %22 = arith.addf %16, %21 : vector<128x128xf32>
    %23 = vector.extract_strided_slice %10 {offsets = [0, 2, 0], sizes = [8, 16, 8], strides = [1, 1, 1]} : vector<8x18x8xbf16> to vector<8x16x8xbf16>
    %24 = vector.shape_cast %23 : vector<8x16x8xbf16> to vector<128x8xbf16>
    %c0_30 = arith.constant 0 : index
    %c2 = arith.constant 2 : index
    %c0_31 = arith.constant 0 : index
    %c0_32 = arith.constant 0 : index
    %25 = vector.load %arg5[%c0_30, %c2, %c0_31, %c0_32] : memref<3x3x8x128xbf16, #tpu.memory_space<vmem>>, vector<1x1x8x128xbf16>
    %26 = vector.shape_cast %25 : vector<1x1x8x128xbf16> to vector<8x128xbf16>
    %cst_33 = arith.constant dense<0.000000e+00> : vector<128x128xf32>
    %27 = tpu.matmul %24, %26, %cst_33 {dimension_numbers = #tpu.dot_dimension_numbers<[1], [0], [0], [1], [0, 0, 1, 1], [], []>} : vector<128x8xbf16>, vector<8x128xbf16>, vector<128x128xf32> -> vector<128x128xf32>
    %28 = arith.addf %22, %27 : vector<128x128xf32>
    %c1_34 = arith.constant 1 : index
    %c0_35 = arith.constant 0 : index
    %c0_36 = arith.constant 0 : index
    %29 = vector.load %arg9[%c1_34, %c0_35, %c0_36] : memref<10x18x8xbf16, #tpu.memory_space<vmem>>, vector<8x18x8xbf16>
    %30 = vector.extract_strided_slice %29 {offsets = [0, 0, 0], sizes = [8, 16, 8], strides = [1, 1, 1]} : vector<8x18x8xbf16> to vector<8x16x8xbf16>
    %31 = vector.shape_cast %30 : vector<8x16x8xbf16> to vector<128x8xbf16>
    %c1_37 = arith.constant 1 : index
    %c0_38 = arith.constant 0 : index
    %c0_39 = arith.constant 0 : index
    %c0_40 = arith.constant 0 : index
    %32 = vector.load %arg5[%c1_37, %c0_38, %c0_39, %c0_40] : memref<3x3x8x128xbf16, #tpu.memory_space<vmem>>, vector<1x1x8x128xbf16>
    %33 = vector.shape_cast %32 : vector<1x1x8x128xbf16> to vector<8x128xbf16>
    %cst_41 = arith.constant dense<0.000000e+00> : vector<128x128xf32>
    %34 = tpu.matmul %31, %33, %cst_41 {dimension_numbers = #tpu.dot_dimension_numbers<[1], [0], [0], [1], [0, 0, 1, 1], [], []>} : vector<128x8xbf16>, vector<8x128xbf16>, vector<128x128xf32> -> vector<128x128xf32>
    %35 = arith.addf %28, %34 : vector<128x128xf32>
    %36 = vector.extract_strided_slice %29 {offsets = [0, 1, 0], sizes = [8, 16, 8], strides = [1, 1, 1]} : vector<8x18x8xbf16> to vector<8x16x8xbf16>
    %37 = vector.shape_cast %36 : vector<8x16x8xbf16> to vector<128x8xbf16>
    %c1_42 = arith.constant 1 : index
    %c1_43 = arith.constant 1 : index
    %c0_44 = arith.constant 0 : index
    %c0_45 = arith.constant 0 : index
    %38 = vector.load %arg5[%c1_42, %c1_43, %c0_44, %c0_45] : memref<3x3x8x128xbf16, #tpu.memory_space<vmem>>, vector<1x1x8x128xbf16>
    %39 = vector.shape_cast %38 : vector<1x1x8x128xbf16> to vector<8x128xbf16>
    %cst_46 = arith.constant dense<0.000000e+00> : vector<128x128xf32>
    %40 = tpu.matmul %37, %39, %cst_46 {dimension_numbers = #tpu.dot_dimension_numbers<[1], [0], [0], [1], [0, 0, 1, 1], [], []>} : vector<128x8xbf16>, vector<8x128xbf16>, vector<128x128xf32> -> vector<128x128xf32>
    %41 = arith.addf %35, %40 : vector<128x128xf32>
    %42 = vector.extract_strided_slice %29 {offsets = [0, 2, 0], sizes = [8, 16, 8], strides = [1, 1, 1]} : vector<8x18x8xbf16> to vector<8x16x8xbf16>
    %43 = vector.shape_cast %42 : vector<8x16x8xbf16> to vector<128x8xbf16>
    %c1_47 = arith.constant 1 : index
    %c2_48 = arith.constant 2 : index
    %c0_49 = arith.constant 0 : index
    %c0_50 = arith.constant 0 : index
    %44 = vector.load %arg5[%c1_47, %c2_48, %c0_49, %c0_50] : memref<3x3x8x128xbf16, #tpu.memory_space<vmem>>, vector<1x1x8x128xbf16>
    %45 = vector.shape_cast %44 : vector<1x1x8x128xbf16> to vector<8x128xbf16>
    %cst_51 = arith.constant dense<0.000000e+00> : vector<128x128xf32>
    %46 = tpu.matmul %43, %45, %cst_51 {dimension_numbers = #tpu.dot_dimension_numbers<[1], [0], [0], [1], [0, 0, 1, 1], [], []>} : vector<128x8xbf16>, vector<8x128xbf16>, vector<128x128xf32> -> vector<128x128xf32>
    %47 = arith.addf %41, %46 : vector<128x128xf32>
    %c2_52 = arith.constant 2 : index
    %c0_53 = arith.constant 0 : index
    %c0_54 = arith.constant 0 : index
    %48 = vector.load %arg9[%c2_52, %c0_53, %c0_54] : memref<10x18x8xbf16, #tpu.memory_space<vmem>>, vector<8x18x8xbf16>
    %49 = vector.extract_strided_slice %48 {offsets = [0, 0, 0], sizes = [8, 16, 8], strides = [1, 1, 1]} : vector<8x18x8xbf16> to vector<8x16x8xbf16>
    %50 = vector.shape_cast %49 : vector<8x16x8xbf16> to vector<128x8xbf16>
    %c2_55 = arith.constant 2 : index
    %c0_56 = arith.constant 0 : index
    %c0_57 = arith.constant 0 : index
    %c0_58 = arith.constant 0 : index
    %51 = vector.load %arg5[%c2_55, %c0_56, %c0_57, %c0_58] : memref<3x3x8x128xbf16, #tpu.memory_space<vmem>>, vector<1x1x8x128xbf16>
    %52 = vector.shape_cast %51 : vector<1x1x8x128xbf16> to vector<8x128xbf16>
    %cst_59 = arith.constant dense<0.000000e+00> : vector<128x128xf32>
    %53 = tpu.matmul %50, %52, %cst_59 {dimension_numbers = #tpu.dot_dimension_numbers<[1], [0], [0], [1], [0, 0, 1, 1], [], []>} : vector<128x8xbf16>, vector<8x128xbf16>, vector<128x128xf32> -> vector<128x128xf32>
    %54 = arith.addf %47, %53 : vector<128x128xf32>
    %55 = vector.extract_strided_slice %48 {offsets = [0, 1, 0], sizes = [8, 16, 8], strides = [1, 1, 1]} : vector<8x18x8xbf16> to vector<8x16x8xbf16>
    %56 = vector.shape_cast %55 : vector<8x16x8xbf16> to vector<128x8xbf16>
    %c2_60 = arith.constant 2 : index
    %c1_61 = arith.constant 1 : index
    %c0_62 = arith.constant 0 : index
    %c0_63 = arith.constant 0 : index
    %57 = vector.load %arg5[%c2_60, %c1_61, %c0_62, %c0_63] : memref<3x3x8x128xbf16, #tpu.memory_space<vmem>>, vector<1x1x8x128xbf16>
    %58 = vector.shape_cast %57 : vector<1x1x8x128xbf16> to vector<8x128xbf16>
    %cst_64 = arith.constant dense<0.000000e+00> : vector<128x128xf32>
    %59 = tpu.matmul %56, %58, %cst_64 {dimension_numbers = #tpu.dot_dimension_numbers<[1], [0], [0], [1], [0, 0, 1, 1], [], []>} : vector<128x8xbf16>, vector<8x128xbf16>, vector<128x128xf32> -> vector<128x128xf32>
    %60 = arith.addf %54, %59 : vector<128x128xf32>
    %61 = vector.extract_strided_slice %48 {offsets = [0, 2, 0], sizes = [8, 16, 8], strides = [1, 1, 1]} : vector<8x18x8xbf16> to vector<8x16x8xbf16>
    %62 = vector.shape_cast %61 : vector<8x16x8xbf16> to vector<128x8xbf16>
    %c2_65 = arith.constant 2 : index
    %c2_66 = arith.constant 2 : index
    %c0_67 = arith.constant 0 : index
    %c0_68 = arith.constant 0 : index
    %63 = vector.load %arg5[%c2_65, %c2_66, %c0_67, %c0_68] : memref<3x3x8x128xbf16, #tpu.memory_space<vmem>>, vector<1x1x8x128xbf16>
    %64 = vector.shape_cast %63 : vector<1x1x8x128xbf16> to vector<8x128xbf16>
    %cst_69 = arith.constant dense<0.000000e+00> : vector<128x128xf32>
    %65 = tpu.matmul %62, %64, %cst_69 {dimension_numbers = #tpu.dot_dimension_numbers<[1], [0], [0], [1], [0, 0, 1, 1], [], []>} : vector<128x8xbf16>, vector<8x128xbf16>, vector<128x128xf32> -> vector<128x128xf32>
    %66 = arith.addf %60, %65 : vector<128x128xf32>
    %c0_70 = arith.constant 0 : index
    %c0_71 = arith.constant 0 : index
    %67 = vector.load %arg6[%c0_70, %c0_71] : memref<1x128xf32, #tpu.memory_space<vmem>>, vector<1x128xf32>
    %68 = vector.broadcast %67 : vector<1x128xf32> to vector<128x128xf32>
    %69 = arith.mulf %66, %68 : vector<128x128xf32>
    %c0_72 = arith.constant 0 : index
    %c0_73 = arith.constant 0 : index
    %70 = vector.load %arg7[%c0_72, %c0_73] : memref<1x128xf32, #tpu.memory_space<vmem>>, vector<1x128xf32>
    %71 = vector.broadcast %70 : vector<1x128xf32> to vector<128x128xf32>
    %72 = arith.addf %69, %71 : vector<128x128xf32>
    %cst_74 = arith.constant 0.000000e+00 : f32
    %73 = vector.broadcast %cst_74 : f32 to vector<128x128xf32>
    %74 = arith.maximumf %72, %73 : vector<128x128xf32>
    %75 = vector.shape_cast %74 : vector<128x128xf32> to vector<8x16x128xf32>
    %c0_75 = arith.constant 0 : index
    %c0_76 = arith.constant 0 : index
    %c0_77 = arith.constant 0 : index
    %c0_78 = arith.constant 0 : index
    %76 = vector.load %arg8[%c0_75, %c0_76, %c0_77, %c0_78] : memref<1x8x16x128xf32, #tpu.memory_space<vmem>>, vector<1x8x16x128xf32>
    %77 = vector.shape_cast %76 : vector<1x8x16x128xf32> to vector<8x16x128xf32>
    %78 = vector.shape_cast %75 : vector<8x16x128xf32> to vector<1x8x16x128xf32>
    tpu.vector_store %arg8[%c0_75, %c0_76, %c0_77, %c0_78], %78 {strides = array<i32>} : memref<1x8x16x128xf32, #tpu.memory_space<vmem>>, vector<1x8x16x128xf32>,
    return
  }
  func.func @transform_0(%arg0: i32, %arg1: i32) -> (i32, i32, i32, i32) {
    %c0_i32 = arith.constant 0 : i32
    %c0_i32_0 = arith.constant 0 : i32
    %c0_i32_1 = arith.constant 0 : i32
    return %arg0, %arg1, %c0_i32, %c0_i32_0 : i32, i32, i32, i32
  }
  func.func @transform_1(%arg0: i32, %arg1: i32) -> (i32, i32, i32, i32) {
    %c1_i32 = arith.constant 1 : i32
    %0 = arith.addi %arg1, %c1_i32 : i32
    %c8_i32 = arith.constant 8 : i32
    %1 = arith.muli %0, %c8_i32 : i32
    %c0_i32 = arith.constant 0 : i32
    %c0_i32_0 = arith.constant 0 : i32
    %c0_i32_1 = arith.constant 0 : i32
    return %arg0, %1, %c0_i32, %c0_i32_0 : i32, i32, i32, i32
  }
  func.func @transform_2(%arg0: i32, %arg1: i32) -> (i32, i32, i32, i32) {
    %c1_i32 = arith.constant 1 : i32
    %0 = arith.addi %arg1, %c1_i32 : i32
    %c8_i32 = arith.constant 8 : i32
    %1 = arith.muli %0, %c8_i32 : i32
    %c1_i32_0 = arith.constant 1 : i32
    %2 = arith.addi %1, %c1_i32_0 : i32
    %c0_i32 = arith.constant 0 : i32
    %c0_i32_1 = arith.constant 0 : i32
    %c0_i32_2 = arith.constant 0 : i32
    return %arg0, %2, %c0_i32, %c0_i32_1 : i32, i32, i32, i32
  }
  func.func @transform_3(%arg0: i32, %arg1: i32) -> (i32, i32, i32, i32) {
    %c0_i32 = arith.constant 0 : i32
    %c0_i32_0 = arith.constant 0 : i32
    %c0_i32_1 = arith.constant 0 : i32
    %c0_i32_2 = arith.constant 0 : i32
    %c0_i32_3 = arith.constant 0 : i32
    return %c0_i32, %c0_i32_0, %c0_i32_1, %c0_i32_2 : i32, i32, i32, i32
  }
  func.func @transform_4(%arg0: i32, %arg1: i32) -> (i32, i32) {
    %c0_i32 = arith.constant 0 : i32
    %c0_i32_0 = arith.constant 0 : i32
    %c0_i32_1 = arith.constant 0 : i32
    return %c0_i32, %c0_i32_0 : i32, i32
  }
  func.func @transform_5(%arg0: i32, %arg1: i32) -> (i32, i32) {
    %c0_i32 = arith.constant 0 : i32
    %c0_i32_0 = arith.constant 0 : i32
    %c0_i32_1 = arith.constant 0 : i32
    return %c0_i32, %c0_i32_0 : i32, i32
  }
  func.func @transform_6(%arg0: i32, %arg1: i32) -> (i32, i32, i32, i32) {
    %c0_i32 = arith.constant 0 : i32
    %c0_i32_0 = arith.constant 0 : i32
    %c0_i32_1 = arith.constant 0 : i32
    return %arg0, %arg1, %c0_i32, %c0_i32_0 : i32, i32, i32, i32
  }
}

</mosaic_0001>

<bundles_post_ra>
// kernel: tpu_custom_call.1
= control target key start
LH: loop header
LB: loop body
LE: loop exit
PB: predicated region body
PF: predicated region fallthrough
CT: control target
= control target key end

     0   :  { %11 = vsyncpa [#allocation4], 0  ;;  %s5055_s0 = inlined_call_operand.vmem [shape: bf16[2,18,18,8], index: 0, kind: input, shape index: {}]   ;;  %s5056_s1 = inlined_call_operand.vmem [shape: bf16[2,18,18,8], index: 1, kind: input, shape index: {}]   ;;  %s5057_s2 = inlined_call_operand.vmem [shape: bf16[2,18,18,8], index: 2, kind: input, shape index: {}]   ;;  %s5058_s3 = inlined_call_operand.vmem [shape: bf16[3,3,8,128], index: 3, kind: input, shape index: {}]   ;;  %s5059_s4 = inlined_call_operand.vmem [shape: f32[1,128], index: 4, kind: input, shape index: {}]   ;;  %s5060_s5 = inlined_call_operand.vmem [shape: f32[1,128], index: 5, kind: input, shape index: {}]   ;;  %s5061_s6 = inlined_call_operand.hbm [shape: f32[2,16,16,128], index: 6, kind: output, shape index: {}]  }
   0x1   :  { %13 = vsyncpa [#allocation4 + $0x1], 0  ;;  %s3883_s21 = smov 0   ;;  %s3885_s22 = smov 0  }
   0x2   :  { %s3887_s23 = smov 0   ;;  %s3889_s24 = smov 0  }
   0x3   :  { %s3891_s25 = smov 0   ;;  %s3893_s26 = smov 0  }
   0x4   :  { %s3895_s27 = smov 0   ;;  %s3897_s28 = smov 0  }
   0x5 LB: > { %s3058_s29 = sadd.s32 4294967295, %s3843_s28   ;;  %s3059_s30 = sadd.s32 4294967294, %s3843_s28   ;;  %s3843_s28 = sphi %s3897_s28, %s19_s28   ;;  %s3839_s27 = sphi %s3895_s27, %s5141_s27   ;;  %s3835_s26 = sphi %s3893_s26, %s5140_s26   ;;  %s3831_s25 = sphi %s3891_s25, %s5139_s25   ;;  %s3827_s24 = sphi %s3889_s24, %s5138_s24   ;;  %s3823_s23 = sphi %s3887_s23, %s5137_s23   ;;  %s3819_s22 = sphi %s3885_s22, %s5136_s22   ;;  %s3815_s21 = sphi %s3883_s21, %s5135_s21  }
   0x6   : > { %s28_s7 = sadd.s32 1, %s3835_s26  ;;  %s31_s8 = sadd.s32 1, %s3839_s27 }
   0x7   : > { %p29_p0 = scmp.ge.s32.totalorder %s28_s7, 2  ;;  %p207_p1 = scmp.ne.s32.totalorder %s3823_s23, %s3819_s22 }
   0x8   : > { %p208_p2 = scmp.eq.s32.totalorder %s3058_s29, 3  ;;  %p213_p5 = scmp.ne.s32.totalorder %s3819_s22, %s3815_s21 }
   0x9   : > { %s5143_s7 = smov (%p29_p0, %s28_s7), 0  ;;  %s5145_s8 = smov (!%p29_p0, %s31_s8), %s3839_s27 }
   0xa   : > { %s193_s9 = ssub.s32 %s3835_s26, %s5143_s7  ;;  %p3934_p3 = por %p208_p2, %p207_p1 }
   0xb   : > { %p33_p4 = scmp.ge.s32.totalorder %s5145_s8, 2  ;;  %p214_p6 = scmp.eq.s32.totalorder %s3059_s30, 3 }
   0xc   : > { %p3066_p7 = scmp.ge.s32.totalorder %s3843_s28, 1  ;;  %p299_p9 = scmp.lt.s32.totalorder %s3843_s28, 5 }
   0xd   : > { %s5147_s8 = smov (%p33_p4, %s5145_s8), 0  ;;  %p3943_p8 = por %p214_p6, %p213_p5 }
   0xe   : > { %s192_s12 = ssub.s32 %s3839_s27, %s5147_s8  ;;  %s197_s13 = sadd.s32 1, %s3823_s23 }
   0xf   : > { %s194_s14 = sor.u32 %s193_s9, %s192_s12  ;;  %p300_p10 = pnand %p3066_p7, %p299_p9 }
  0x10   : > { %p195_p11 = scmp.eq.s32.totalorder %s194_s14, 0 }
  0x11   : > { %303 = sbr.rel (%p300_p10) target bundleno = 465 (0x1d1), region = 44 }
  0x12   : > { %s3952_s15 = scalar_select %p195_p11, %s3823_s23, %s197_s13  }
  0x18   : > { %v3074_v0 = vld [vmem:[%s5058_s3 + $0x4] sm:$0xf]  ;;  %vm748_vm0 = vcmask 1043456   ;;  %v3149_v1 = vld [vmem:[%s5058_s3 + $0x10] sm:$0xf]  ;;  %s3961_s20 = sshll.u32 %s3827_s24, 3 }
  0x19   : > { %3645 = vmatprep.subr.msk.bf16.mxu1 %vm748_vm0, %v3074_v0  ;;  %3649 = vmatprep.subr.msk.bf16.mxu0 %vm748_vm0, %v3149_v1  ;;  %v750_v2 = vsel %vm748_vm0, %v3074_v0, 0  ;;  %v3967_v3 = vsel %vm748_vm0, %v3149_v1, 0  ;;  %p368_p12 = scmp.lt.s32.totalorder %s3831_s25, 1  ;;  %p370_p13 = scmp.lt.s32.totalorder %s3961_s20, 17  ;;  %v3976_v4 = vld [vmem:[%s5058_s3] sm:$0xf] }
  0x1a   : > { %5086 = vst [vmem:[#allocation6_spill] sm:$0xff] %v3967_v3  ;;  %3354 = vmatpush3.bf16.msra.mxu1 %v750_v2  ;;  %3426 = vmatpush3.bf16.msra.mxu0 %v3967_v3  ;;  %v3981_v5 = vld [vmem:[%s5058_s3 + $0x14] sm:$0xf]  ;;  %vm437_vm1 = vcmask 60416   ;;  %vm440_vm2 = vcmask 57344   ;;  %vm723_vm5 = vcmask 64512  }
  0x1b   : > { %s369_s29 = scalar_select %p368_p12, %s3831_s25, 1  ;;  %3646 = vmatprep.subr.msk.bf16.mxu1 %vm748_vm0, %v3976_v4  ;;  %3651 = vmatprep.subr.msk.bf16.mxu0 %vm748_vm0, %v3981_v5  ;;  %vm502_vm3 = vsmask.f32 3328  ;;  %vm503_vm4 = vsmask.f32 7440  ;;  %v4063_v41 = vsel %vm748_vm0, %v3976_v4, 0 }
  0x1c   : > { %s371_s14 = scalar_select %p370_p13, %s3961_s20, 17  ;;  %vm4076_vm6 = vmor %vm502_vm3, %vm503_vm4  ;;  %v4082_v60 = vsel %vm748_vm0, %v3981_v5, 0  ;;  %vm1021_vm7 = vcmask 1042432   ;;  %vm1022_vm8 = vcmask 1046532   ;;  %v4932_v56 = vld [vmem:[%s5059_s4] ss:$0 sm:$0xff] }
  0x1d   : > { %s3988_s16 = smul.u32 54, %s369_s29  ;;  %s4085_s29 = sadd.s32 8, %s3961_s20  ;;  %vm4261_vm9 = vmor %vm1021_vm7, %vm1022_vm8 }
  0x1e   : > { %s3655_s17 = smul.u32 3, %s371_s14  ;;  %p387_p0 = scmp.lt.s32.totalorder %s4085_s29, 17 }
  0x1f   : > { %s398_s30 = sadd.s32 1, %s4085_s29 }
  0x20   : > { %s374_s18 = sadd.s32 %s3988_s16, %s3655_s17  ;;  %p4180_p1 = scmp.lt.s32.totalorder %s398_s30, 17 }
  0x21   : > { %s3069_s19 = sshll.u32 %s374_s18, 2 }
  0x22   : > { %s3994_s12 = scalar_lea.vmem %s5055_s0, %s3069_s19  ;;  %s5149_s30 = smov (!%p4180_p1, %s398_s30), 17 }
  0x23   : > { %v413_v6 = vld [vmem:[%s3994_s12] sm:$0xf]  ;;  %v414_v7 = vld [vmem:[%s3994_s12 + $0x4] sm:$0xf]  ;;  %v415_v8 = vld [vmem:[%s3994_s12 + $0x8] sm:$0x1] }
  0x24   : > { %438 = vst.msk [vmem:[#allocation2] sm:$0xf] %vm437_vm1, %v413_v6  ;;  %439 = vst.msk [vmem:[#allocation2 + $0x4] sm:$0xf] %vm437_vm1, %v414_v7  ;;  %v416_v9 = vld [vmem:[%s3994_s12 + $0xc] sm:$0xf] }
  0x25   : > { %441 = vst.msk [vmem:[#allocation2 + $0x8] sm:$0x1] %vm440_vm2, %v415_v8  ;;  %v417_v10 = vld [vmem:[%s3994_s12 + $0x10] sm:$0xf]  ;;  %v418_v11 = vld [vmem:[%s3994_s12 + $0x14] sm:$0x1] }
  0x26   : > { %442 = vst.msk [vmem:[#allocation2 + $0xc] sm:$0xf] %vm437_vm1, %v416_v9  ;;  %443 = vst.msk [vmem:[#allocation2 + $0x10] sm:$0xf] %vm437_vm1, %v417_v10  ;;  %v419_v12 = vld [vmem:[%s3994_s12 + $0x18] sm:$0xf] }
  0x27   : > { %444 = vst.msk [vmem:[#allocation2 + $0x14] sm:$0x1] %vm440_vm2, %v418_v11  ;;  %v420_v13 = vld [vmem:[%s3994_s12 + $0x1c] sm:$0xf]  ;;  %v421_v14 = vld [vmem:[%s3994_s12 + $0x20] sm:$0x1] }
  0x28   : > { %445 = vst.msk [vmem:[#allocation2 + $0x18] sm:$0xf] %vm437_vm1, %v419_v12  ;;  %446 = vst.msk [vmem:[#allocation2 + $0x1c] sm:$0xf] %vm437_vm1, %v420_v13  ;;  %v422_v15 = vld [vmem:[%s3994_s12 + $0x24] sm:$0xf] }
  0x29   : > { %447 = vst.msk [vmem:[#allocation2 + $0x20] sm:$0x1] %vm440_vm2, %v421_v14  ;;  %v423_v16 = vld [vmem:[%s3994_s12 + $0x28] sm:$0xf]  ;;  %v424_v17 = vld [vmem:[%s3994_s12 + $0x2c] sm:$0x1] }
  0x2a   : > { %448 = vst.msk [vmem:[#allocation2 + $0x24] sm:$0xf] %vm437_vm1, %v422_v15  ;;  %449 = vst.msk [vmem:[#allocation2 + $0x28] sm:$0xf] %vm437_vm1, %v423_v16  ;;  %v425_v18 = vld [vmem:[%s3994_s12 + $0x30] sm:$0xf] }
  0x2b   : > { %450 = vst.msk [vmem:[#allocation2 + $0x2c] sm:$0x1] %vm440_vm2, %v424_v17  ;;  %v426_v19 = vld [vmem:[%s3994_s12 + $0x34] sm:$0xf]  ;;  %v427_v20 = vld [vmem:[%s3994_s12 + $0x38] sm:$0x1] }
  0x2c   : > { %451 = vst.msk [vmem:[#allocation2 + $0x30] sm:$0xf] %vm437_vm1, %v425_v18  ;;  %452 = vst.msk [vmem:[#allocation2 + $0x34] sm:$0xf] %vm437_vm1, %v426_v19  ;;  %v428_v21 = vld [vmem:[%s3994_s12 + $0x3c] sm:$0xf] }
  0x2d   : > { %453 = vst.msk [vmem:[#allocation2 + $0x38] sm:$0x1] %vm440_vm2, %v427_v20  ;;  %v429_v22 = vld [vmem:[%s3994_s12 + $0x40] sm:$0xf]  ;;  %v430_v23 = vld [vmem:[%s3994_s12 + $0x44] sm:$0x1] }
  0x2e   : > { %454 = vst.msk [vmem:[#allocation2 + $0x3c] sm:$0xf] %vm437_vm1, %v428_v21  ;;  %455 = vst.msk [vmem:[#allocation2 + $0x40] sm:$0xf] %vm437_vm1, %v429_v22  ;;  %v431_v24 = vld [vmem:[%s3994_s12 + $0x48] sm:$0xf] }
  0x2f   : > { %456 = vst.msk [vmem:[#allocation2 + $0x44] sm:$0x1] %vm440_vm2, %v430_v23  ;;  %v432_v25 = vld [vmem:[%s3994_s12 + $0x4c] sm:$0xf]  ;;  %v433_v26 = vld [vmem:[%s3994_s12 + $0x50] sm:$0x1] }
  0x30   : > { %457 = vst.msk [vmem:[#allocation2 + $0x48] sm:$0xf] %vm437_vm1, %v431_v24  ;;  %458 = vst.msk [vmem:[#allocation2 + $0x4c] sm:$0xf] %vm437_vm1, %v432_v25  ;;  %v434_v27 = vld [vmem:[%s3994_s12 + $0x54] sm:$0xf] }
  0x31   : > { %459 = vst.msk [vmem:[#allocation2 + $0x50] sm:$0x1] %vm440_vm2, %v433_v26  ;;  %v435_v28 = vld [vmem:[%s3994_s12 + $0x58] sm:$0xf]  ;;  %v436_v29 = vld [vmem:[%s3994_s12 + $0x5c] sm:$0x1] }
  0x32   : > { %v4041_v30 = vld [vmem:[#allocation2] sm:$0xf]  ;;  %v4043_v31 = vld [vmem:[#allocation2 + $0x4] sm:$0xf]  ;;  %v4045_v32 = vld [vmem:[#allocation2 + $0x8] sm:$0x1] }
  0x33   : > { %460 = vst.msk [vmem:[#allocation2 + $0x54] sm:$0xf] %vm437_vm1, %v434_v27  ;;  %461 = vst.msk [vmem:[#allocation2 + $0x58] sm:$0xf] %vm437_vm1, %v435_v28  ;;  %v506_v33 = vshrl.u32 %v4041_v30, 16  ;;  %v509_v34 = vshll.u32 %v4041_v30, 16 }
  0x34   : > { %462 = vst.msk [vmem:[#allocation2 + $0x5c] sm:$0x1] %vm440_vm2, %v436_v29  ;;  %v515_v35 = vshll.u32 %v4043_v31, 16  ;;  %v519_v36 = vshrl.u32 %v4043_v31, 16  ;;  %v4054_v37 = vld [vmem:[#allocation2 + $0xc] sm:$0xf] }
  0x35   : > { %v525_v38 = vshll.u32 %v4045_v32, 16  ;;  %v4057_v39 = vld [vmem:[#allocation2 + $0x10] sm:$0xf]  ;;  %v4059_v40 = vld [vmem:[#allocation2 + $0x14] sm:$0x1]  ;;  %v508_v42 = vrot.slane %v506_v33, 4 }
  0x36   : > { %v511_v43 = vrot.slane %v509_v34, 5  ;;  %v517_v44 = vrot.slane %v515_v35, 5  ;;  %v521_v45 = vrot.slane %v519_v36, 4  ;;  %v1454_v47 = vshrl.u32 %v4054_v37, 16  ;;  %v4070_v54 = vld [vmem:[#allocation2 + $0xc] sm:$0xf] }
  0x37   : > { %v527_v46 = vrot.slane %v525_v38, 5  ;;  %v1457_v48 = vshll.u32 %v4054_v37, 16  ;;  %v1463_v49 = vshll.u32 %v4057_v39, 16  ;;  %v1467_v52 = vshrl.u32 %v4057_v39, 16  ;;  %v4072_v55 = vld [vmem:[#allocation2 + $0x10] sm:$0xf] }
  0x38   : > { %v512_v50 = vor.u32 %v511_v43, %v508_v42  ;;  %v522_v51 = vor.u32 %v521_v45, %v517_v44  ;;  %v1473_v53 = vshll.u32 %v4059_v40, 16  ;;  %v1456_v57 = vrot.slane %v1454_v47, 4  ;;  %v4087_v2 = vld [vmem:[#allocation2 + $0x14] sm:$0x1]  ;;  %v4100_v11 = vld [vmem:[%s5058_s3 + $0x18] sm:$0xf] }
  0x39   : > { %v1459_v58 = vrot.slane %v1457_v48, 5  ;;  %v1465_v59 = vrot.slane %v1463_v49, 5  ;;  %v1469_v63 = vrot.slane %v1467_v52, 4  ;;  %v530_v4 = vshrl.u32 %v4070_v54, 16  ;;  %v4102_v16 = vld [vmem:[#allocation2 + $0x18] sm:$0xf] }
  0x3a   : > { %v513_v61 = vrot.slane %v512_v50, 4  ;;  %v523_v62 = vrot.slane %v522_v51, 4  ;;  %v1475_v0 = vrot.slane %v1473_v53, 5  ;;  %v533_v6 = vshll.u32 %v4070_v54, 16  ;;  %v4106_v21 = vld [vmem:[#allocation2 + $0x1c] sm:$0xf] }
  0x3b   : > { %v1460_v1 = vor.u32 %v1459_v58, %v1456_v57  ;;  %v539_v7 = vshll.u32 %v4072_v55, 16  ;;  %v1470_v9 = vor.u32 %v1469_v63, %v1465_v59  ;;  %v543_v10 = vshrl.u32 %v4072_v55, 16  ;;  %v4112_v25 = vld [vmem:[#allocation2 + $0x20] sm:$0x1]  ;;  %v4123_v42 = vld [vmem:[#allocation2 + $0x18] sm:$0xf] }
  0x3c   : > { %v518_v5 = vsel %vm4076_vm6, %v513_v61, %v517_v44  ;;  %v528_v8 = vsel %vm4076_vm6, %v523_v62, %v527_v46  ;;  %v532_v14 = vrot.slane %v530_v4, 4  ;;  %v535_v15 = vrot.slane %v533_v6, 5  ;;  %s4128_s14 = scalar_select %p387_p0, %s4085_s29, 17  ;;  %v4132_v47 = vld [vmem:[#allocation2 + $0x1c] sm:$0xf] }
  0x3d   : > { %v3075_v12 = vcombine.low %v518_v5, %v528_v8  ;;  %v1461_v13 = vrot.slane %v1460_v1, 4  ;;  %v1471_v17 = vrot.slane %v1470_v9, 4  ;;  %v541_v18 = vrot.slane %v539_v7, 5  ;;  %v4138_v52 = vld [vmem:[#allocation2 + $0x20] sm:$0x1]  ;;  %s3658_s17 = smul.u32 3, %s5149_s30 }
  0x3e   : > { %v545_v19 = vrot.slane %v543_v10, 4  ;;  %v549_v20 = vshll.u32 %v4087_v2, 16  ;;  %v1824_v23 = vrot.slane %v4059_v40, 5  ;;  %v536_v24 = vor.u32 %v535_v15, %v532_v14  ;;  %v4143_v61 = vld [vmem:[#allocation2 + $0x24] sm:$0xf]  ;;  %s3657_s19 = smul.u32 3, %s4128_s14 }
  0x3f   : > { %3355 = vmatprep.mubr.msk.bf16.mxu1 %vm723_vm5, %v3075_v12  ;;  %v1466_v22 = vsel %vm4076_vm6, %v1461_v13, %v1465_v59  ;;  %v4116_v26 = vsel %vm748_vm0, %v4100_v11, 0  ;;  %v1476_v27 = vsel %vm4076_vm6, %v1471_v17, %v1475_v0  ;;  %v1478_v33 = vshrl.u32 %v4102_v16, 16  ;;  %v4150_v4 = vld [vmem:[%s5058_s3 + $0x8] sm:$0xf]  ;;  %s4252_s18 = sadd.s32 %s3658_s17, %s3988_s16  ;;  %s3255_s17 = sshll.u32 %s3831_s25, 5 }
  0x40   : > { %v546_v28 = vor.u32 %v545_v19, %v541_v18  ;;  %v551_v29 = vrot.slane %v549_v20, 5  ;;  %v3150_v34 = vcombine.low %v1466_v22, %v1476_v27  ;;  %v537_v35 = vrot.slane %v536_v24, 4  ;;  %v4158_v13 = vld [vmem:[#allocation2 + $0x28] sm:$0xf]  ;;  %v4162_v20 = vld [vmem:[#allocation2 + $0x2c] sm:$0x1]  ;;  %s4176_s9 = sadd.s32 %s3657_s19, %s3988_s16 }
  0x41   : > { %v1481_v36 = vshll.u32 %v4102_v16, 16  ;;  %v1487_v38 = vshll.u32 %v4106_v21, 16  ;;  %v1480_v44 = vrot.slane %v1478_v33, 4  ;;  %v1491_v45 = vshrl.u32 %v4106_v21, 16  ;;  %s3071_s20 = sshll.u32 %s4176_s9, 2  ;;  %s3073_s16 = sshll.u32 %s4252_s18, 2 }
  0x42   : > { %v547_v43 = vrot.slane %v546_v28, 4  ;;  %v1497_v46 = vshll.u32 %v4112_v25, 16  ;;  %3427 = vmatprep.mubr.msk.bf16.mxu0 %vm723_vm5, %v3150_v34  ;;  %v542_v48 = vsel %vm4076_vm6, %v537_v35, %v541_v18  ;;  %v1828_v51 = vrot.slane %v4106_v21, 5  ;;  %s393_s14 = scalar_lea.vmem %s5056_s1, %s3071_s20  ;;  %s4283_s9 = scalar_lea.vmem %s5057_s2, %s3073_s16 }
  0x43   : > { %v1483_v49 = vrot.slane %v1481_v36, 5  ;;  %v1489_v50 = vrot.slane %v1487_v38, 5  ;;  %v1493_v57 = vrot.slane %v1491_v45, 4  ;;  %v1831_v59 = vrot.slane %v4112_v25, 5  ;;  %v4185_v45 = vld [vmem:[#allocation2 + $0x28] sm:$0xf] }
  0x44   : > { %v552_v53 = vsel %vm4076_vm6, %v547_v43, %v551_v29  ;;  %v1499_v58 = vrot.slane %v1497_v46, 5  ;;  %v554_v0 = vshrl.u32 %v4123_v42, 16  ;;  %v557_v1 = vshll.u32 %v4123_v42, 16  ;;  %v4167_v29 = vld [vmem:[#allocation2 + $0x24] sm:$0xf]  ;;  %s359_s19 = sand.u32 1, %s3819_s22  }
  0x45   : > { %v3076_v62 = vcombine.low %v542_v48, %v552_v53  ;;  %v1484_v63 = vor.u32 %v1483_v49, %v1480_v44  ;;  %v1494_v6 = vor.u32 %v1493_v57, %v1489_v50  ;;  %v563_v7 = vshll.u32 %v4132_v47, 16  ;;  %s3067_s29 = sshll.u32 %s359_s19, 7  ;;  %s5003_s12 = scalar_lea.sflag [#allocation4], %s359_s19 }
  0x46   : > { %v567_v5 = vshrl.u32 %v4132_v47, 16  ;;  %v573_v8 = vshll.u32 %v4138_v52, 16  ;;  %v556_v10 = vrot.slane %v554_v0, 4  ;;  %v559_v12 = vrot.slane %v557_v1, 5  ;;  %v4194_v0 = vld [vmem:[#allocation2 + $0x30] sm:$0xf] }
  0x47   : > { %3356 = vmatmul.mubr.msk.bf16.vlgmr.msra.gmra.mrb[0].mxu1 %vm723_vm5, %v3076_v62  ;;  %v1485_v9 = vrot.slane %v1484_v63, 4  ;;  %v1502_v14 = vshrl.u32 %v4143_v61, 16  ;;  %v1495_v15 = vrot.slane %v1494_v6, 4  ;;  %v565_v17 = vrot.slane %v563_v7, 5  ;;  %s4949_s13 = scalar_lea.vmem [#allocation3], %s3067_s29  ;;  %s3845_s29 = smov [#allocation3]  }
  0x48   : > { %3372 = vmatpush3.bf16.msra.mxu1 %v4063_v41  ;;  %v569_v18 = vrot.slane %v567_v5, 4  ;;  %v575_v19 = vrot.slane %v573_v8, 5  ;;  %v560_v24 = vor.u32 %v559_v12, %v556_v10  ;;  %v1505_v28 = vshll.u32 %v4143_v61, 16  ;;  %s2931_s18 = sshll.u32 %s4949_s13, 4  ;;  %s4996_s18 = int_to_ptr.vmem [resolvable:$true] %s2931_s18 }
  0x49   : > { %v1490_v22 = vsel %vm4076_vm6, %v1485_v9, %v1489_v50  ;;  %v1504_v27 = vrot.slane %v1502_v14, 4  ;;  %3647 = vmatprep.subr.msk.bf16.mxu1 %vm748_vm0, %v4150_v4  ;;  %v1500_v41 = vsel %vm4076_vm6, %v1495_v15, %v1499_v58  ;;  %v1511_v34 = vshll.u32 %v4158_v13, 16  ;;  %v4187_v50 = vld [vmem:[#allocation2 + $0x2c] sm:$0x1]  ;;  %v4208_v14 = vld [vmem:[#allocation2 + $0x34] sm:$0xf] }
  0x4a   : > { %v570_v33 = vor.u32 %v569_v18, %v565_v17  ;;  %v1515_v35 = vshrl.u32 %v4158_v13, 16  ;;  %v3151_v36 = vcombine.low %v1490_v22, %v1500_v41  ;;  %v561_v38 = vrot.slane %v560_v24, 4  ;;  %s3749_s20 = scalar_lea.vmem %s4996_s18, 2048 }
  0x4b   : > { %v1507_v43 = vrot.slane %v1505_v28, 5  ;;  %v1521_v44 = vshll.u32 %v4162_v20, 16  ;;  %v1513_v48 = vrot.slane %v1511_v34, 5  ;;  %v578_v53 = vshrl.u32 %v4167_v29, 16  ;;  %v4223_v28 = vld [vmem:[#allocation2 + $0x30] sm:$0xf]  ;;  %p3750_p2 = scmp.ne.s32.totalorder %s4996_s18, %s3749_s20 }
  0x4c   : > { %v571_v46 = vrot.slane %v570_v33, 4  ;;  %v1517_v49 = vrot.slane %v1515_v35, 4  ;;  %3428 = vmatmul.mubr.msk.bf16.vlgmr.msra.gmra.mrb[0].mxu0 %vm723_vm5, %v3151_v36  ;;  %v566_v57 = vsel %vm4076_vm6, %v561_v38, %v565_v17  ;;  %v581_v63 = vshll.u32 %v4167_v29, 16  ;;  %v4228_v36 = vld [vmem:[#allocation2 + $0x34] sm:$0xf] }
  0x4d   : > { %v1508_v58 = vor.u32 %v1507_v43, %v1504_v27  ;;  %v1523_v62 = vrot.slane %v1521_v44, 5  ;;  %3444 = vmatpush3.bf16.msra.mxu0 %v4082_v60  ;;  %v580_v7 = vrot.slane %v578_v53, 4  ;;  %v587_v5 = vshll.u32 %v4185_v45, 16  ;;  %v4220_v27 = vld [vmem:[#allocation2 + $0x38] sm:$0x1]  ;;  %p3751_p4 = pnand %p3750_p2, %p3934_p3 }
  0x4e   : > { %v576_v1 = vsel %vm4076_vm6, %v571_v46, %v575_v19  ;;  %v1518_v6 = vor.u32 %v1517_v49, %v1513_v48  ;;  %v583_v10 = vrot.slane %v581_v63, 5  ;;  %v591_v12 = vshrl.u32 %v4185_v45, 16  ;;  %3652 = vmatprep.subr.msk.bf16.mxu0 %vm748_vm0, %v4100_v11  ;;  %v464_v49 = vld [vmem:[%s393_s14 + $0x4] sm:$0xf]  ;;  %v465_v63 = vld [vmem:[%s393_s14 + $0x8] sm:$0x1] }
  0x4f   : > { %v3077_v8 = vcombine.low %v566_v57, %v576_v1  ;;  %v1509_v9 = vrot.slane %v1508_v58, 4  ;;  %v589_v15 = vrot.slane %v587_v5, 5  ;;  %v597_v17 = vshll.u32 %v4187_v50, 16  ;;  %468 = vst.msk [vmem:[#allocation2 + $0x64] sm:$0xf] %vm437_vm1, %v464_v49  ;;  %p3752_p5 = pneg %p3751_p4 }
  0x50   : > { %v1519_v60 = vrot.slane %v1518_v6, 4  ;;  %v1526_v18 = vshrl.u32 %v4194_v0, 16  ;;  %v584_v22 = vor.u32 %v583_v10, %v580_v7  ;;  %v593_v24 = vrot.slane %v591_v12, 4  ;;  %v4239_v5 = vld [vmem:[#allocation2 + $0x38] sm:$0x1] }
  0x51   : > { %3359 = vmatprep.mubr.msk.bf16.mxu1 %vm723_vm5, %v3077_v8  ;;  %v1514_v19 = vsel %vm4076_vm6, %v1509_v9, %v1513_v48  ;;  %v1529_v11 = vshll.u32 %v4194_v0, 16  ;;  %v599_v33 = vrot.slane %v597_v17, 5  ;;  %v1535_v35 = vshll.u32 %v4208_v14, 16  ;;  %v463_v48 = vld [vmem:[%s393_s14] sm:$0xf]  ;;  %s3271_s14 = sshll.u32 %s3827_s24, 4 }
  0x52   : > { %v1524_v41 = vsel %vm4076_vm6, %v1519_v60, %v1523_v62  ;;  %v1528_v34 = vrot.slane %v1526_v18, 4  ;;  %v585_v43 = vrot.slane %v584_v22, 4  ;;  %v594_v44 = vor.u32 %v593_v24, %v589_v15  ;;  %467 = vst.msk [vmem:[#allocation2 + $0x60] sm:$0xf] %vm437_vm1, %v463_v48  ;;  %v4247_v22 = vld [vmem:[#allocation2 + $0x3c] sm:$0xf]  ;;  %s2928_s24 = sadd.s32 %s3271_s14, %s3255_s17 }
  0x53   : > { %v3152_v38 = vcombine.low %v1514_v19, %v1524_v41  ;;  %v1531_v46 = vrot.slane %v1529_v11, 5  ;;  %v1537_v53 = vrot.slane %v1535_v35, 5  ;;  %v1539_v57 = vshrl.u32 %v4208_v14, 16  ;;  %469 = vst.msk [vmem:[#allocation2 + $0x68] sm:$0x1] %vm440_vm2, %v465_v63  ;;  %s3256_s25 = sshll.u32 %s2928_s24, 7 }
  0x54   : > { %v1545_v58 = vshll.u32 %v4220_v27, 16  ;;  %v602_v62 = vshrl.u32 %v4223_v28, 16  ;;  %v590_v1 = vsel %vm4076_vm6, %v585_v43, %v589_v15  ;;  %v595_v6 = vrot.slane %v594_v44, 4  ;;  %v4255_v35 = vld [vmem:[#allocation2 + $0x40] sm:$0xf]  ;;  %s3753_s14 = sshll.u32 %s3845_s29, 4  ;;  %s3754_s14 = int_to_ptr.vmem [resolvable:$false] %s3753_s14 }
  0x55   : > { %3431 = vmatprep.mubr.msk.bf16.mxu0 %vm723_vm5, %v3152_v38  ;;  %v1532_v7 = vor.u32 %v1531_v46, %v1528_v34  ;;  %v605_v8 = vshll.u32 %v4223_v28, 16  ;;  %v1541_v9 = vrot.slane %v1539_v57, 4  ;;  %v611_v60 = vshll.u32 %v4228_v36, 16  ;;  %v4270_v63 = vld [vmem:[#allocation2 + $0x44] sm:$0x1]  ;;  %s3755_s17 = scalar_lea.vmem %s3754_s14, 4096  ;;  %p3756_p6 = scmp.lt.s32.totalorder %s4996_s18, %s3754_s14 }
  0x56   : > { %v1547_v10 = vrot.slane %v1545_v58, 5  ;;  %v604_v12 = vrot.slane %v602_v62, 4  ;;  %v600_v17 = vsel %vm4076_vm6, %v595_v6, %v599_v33  ;;  %v615_v15 = vshrl.u32 %v4228_v36, 16  ;;  %p3757_p7 = scmp.lt.s32.totalorder %s3755_s17, %s3749_s20 }
  0x57   : > { %v1533_v18 = vrot.slane %v1532_v7, 4  ;;  %v607_v19 = vrot.slane %v605_v8, 5  ;;  %v3078_v24 = vcombine.low %v590_v1, %v600_v17  ;;  %v1542_v11 = vor.u32 %v1541_v9, %v1537_v53 }
  0x58   : > { %v613_v41 = vrot.slane %v611_v60, 5  ;;  %v621_v34 = vshll.u32 %v4239_v5, 16  ;;  %v617_v43 = vrot.slane %v615_v15, 4  ;;  %v3166_v46 = vrot.slane %v4054_v37, 9  ;;  %p3758_p9 = por %p3757_p7, %p3756_p6 }
  0x59   : > { %v1538_v33 = vsel %vm4076_vm6, %v1533_v18, %v1537_v53  ;;  %v608_v38 = vor.u32 %v607_v19, %v604_v12  ;;  %3360 = vmatmul.mubr.msk.bf16.gmra.mrb[4].mxu1 %vm723_vm5, %v3078_v24  ;;  %v1543_v48 = vrot.slane %v1542_v11, 4  ;;  %v1821_v57 = vrot.slane %v4057_v39, 5  ;;  %v4291_v24 = vld [vmem:[#allocation2 + $0x48] sm:$0xf] }
  0x5a   : > { %v623_v49 = vrot.slane %v621_v34, 5  ;;  %v626_v58 = vshrl.u32 %v4247_v22, 16  ;;  %v618_v62 = vor.u32 %v617_v43, %v613_v41  ;;  %v629_v1 = vshll.u32 %v4247_v22, 16  ;;  %p3759_p10 = pnand %p3758_p9, %p3752_p5 }
  0x5b   : > { %v609_v53 = vrot.slane %v608_v38, 4  ;;  %v635_v6 = vshll.u32 %v4255_v35, 16  ;;  %v1548_v37 = vsel %vm4076_vm6, %v1543_v48, %v1547_v10  ;;  %v1822_v7 = vsel %vm4261_vm9, %v3166_v46, %v1821_v57 }
  0x5c   : > { %v1823_v8 = vrot.slane %v1821_v57, 4  ;;  %v628_v9 = vrot.slane %v626_v58, 4  ;;  %v3153_v39 = vcombine.low %v1538_v33, %v1548_v37  ;;  %v619_v60 = vrot.slane %v618_v62, 4  ;;  %v4297_v33 = vld [vmem:[#allocation2 + $0x4c] sm:$0xf] }
  0x5d   : > { %v614_v12 = vsel %vm4076_vm6, %v609_v53, %v613_v41  ;;  %v631_v17 = vrot.slane %v629_v1, 5  ;;  %v637_v18 = vrot.slane %v635_v6, 5  ;;  %v639_v19 = vshrl.u32 %v4255_v35, 16  ;;  %v470_v57 = vld [vmem:[%s4283_s9] sm:$0xf] }
  0x5e   : > { %v1825_v10 = vsel %vm4261_vm9, %v1823_v8, %v1824_v23  ;;  %v645_v15 = vshll.u32 %v4270_v63, 16  ;;  %3432 = vmatmul.mubr.msk.bf16.gmra.mrb[4].mxu0 %vm723_vm5, %v3153_v39  ;;  %v624_v11 = vsel %vm4076_vm6, %v619_v60, %v623_v49  ;;  %v3167_v40 = vrot.slane %v4102_v16, 9  ;;  %v4299_v23 = vld [vmem:[#allocation2 + $0x50] sm:$0x1]  ;;  %v471_v62 = vld [vmem:[%s4283_s9 + $0x4] sm:$0xf] }
  0x5f   : > { %v3175_v41 = vcombine.low %v1822_v7, %v1825_v10  ;;  %v632_v34 = vor.u32 %v631_v17, %v628_v9  ;;  %v3079_v38 = vcombine.low %v614_v12, %v624_v11  ;;  %v641_v43 = vrot.slane %v639_v19, 4  ;;  %474 = vst.msk [vmem:[#allocation2 + $0x6c] sm:$0xf] %vm437_vm1, %v470_v57  ;;  %475 = vst.msk [vmem:[#allocation2 + $0x70] sm:$0xf] %vm437_vm1, %v471_v62 }
  0x60   : > { %v647_v46 = vrot.slane %v645_v15, 5  ;;  %v1830_v48 = vrot.slane %v1828_v51, 4  ;;  %v1829_v49 = vsel %vm4261_vm9, %v3167_v40, %v1828_v51  ;;  %v650_v16 = vshrl.u32 %v4291_v24, 16  ;;  %v4323_v39 = vld [vmem:[#allocation2 + $0x54] sm:$0xf] }
  0x61   : > { %3445 = vmatprep.mubr.msk.bf16.mxu0 %vm723_vm5, %v3175_v41  ;;  %v633_v58 = vrot.slane %v632_v34, 4  ;;  %v653_v53 = vshll.u32 %v4291_v24, 16  ;;  %3363 = vmatprep.mubr.msk.bf16.mxu1 %vm723_vm5, %v3079_v38  ;;  %v642_v1 = vor.u32 %v641_v43, %v637_v18  ;;  %v659_v21 = vshll.u32 %v4297_v33, 16  ;;  %v4329_v17 = vld [vmem:[%s5058_s3 + $0x1c] sm:$0xf] }
  0x62   : > { %v1832_v6 = vsel %vm4261_vm9, %v1830_v48, %v1831_v59  ;;  %v663_v37 = vshrl.u32 %v4297_v33, 16  ;;  %v652_v8 = vrot.slane %v650_v16, 4  ;;  %v669_v59 = vshll.u32 %v4299_v23, 16  ;;  %v4334_v11 = vld [vmem:[#allocation2 + $0x58] sm:$0xf] }
  0x63   : > { %v638_v51 = vsel %vm4076_vm6, %v633_v58, %v637_v18  ;;  %v3176_v7 = vcombine.low %v1829_v49, %v1832_v6  ;;  %v655_v9 = vrot.slane %v653_v53, 5  ;;  %v643_v12 = vrot.slane %v642_v1, 4  ;;  %v4338_v38 = vld [vmem:[#allocation2 + $0x5c] sm:$0x1]  ;;  %v472_v48 = vld [vmem:[%s4283_s9 + $0x8] sm:$0x1]  ;;  %s4994_s9 = scalar_lea.hbm %s5061_s6, %s3256_s25 }
  0x64   : > { %v661_v25 = vrot.slane %v659_v21, 5  ;;  %v665_v60 = vrot.slane %v663_v37, 4  ;;  %v3168_v19 = vrot.slane %v4143_v61, 9  ;;  %v1835_v18 = vrot.slane %v4158_v13, 5  ;;  %476 = vst.msk [vmem:[#allocation2 + $0x74] sm:$0x1] %vm440_vm2, %v472_v48 }
  0x65   : > { %v656_v10 = vor.u32 %v655_v9, %v652_v8  ;;  %v1838_v15 = vrot.slane %v4162_v20, 5  ;;  %v648_v41 = vsel %vm4076_vm6, %v643_v12, %v647_v46  ;;  %v671_v40 = vrot.slane %v669_v59, 5  ;;  %v4356_v21 = vld [vmem:[#allocation2 + $0x3c] sm:$0xf]  ;;  %v4362_v8 = vld [vmem:[#allocation2 + $0x40] sm:$0xf] }
  0x66   : > { %v666_v34 = vor.u32 %v665_v60, %v661_v25  ;;  %v674_v43 = vshrl.u32 %v4323_v39, 16  ;;  %v3080_v57 = vcombine.low %v638_v51, %v648_v41  ;;  %3446 = vmatmul.mubr.msk.bf16.vlgmr.msra.gmra.mrb[0].mxu0 %vm723_vm5, %v3176_v7  ;;  %v1836_v13 = vsel %vm4261_vm9, %v3168_v19, %v1835_v18  ;;  %5092 = vst [vmem:[#allocation7_spill] sm:$0xff] %v4356_v21  ;;  %v4364_v9 = vld [vmem:[#allocation2 + $0x44] sm:$0x1] }
  0x67   : > { %v657_v61 = vrot.slane %v656_v10, 4  ;;  %v1837_v20 = vrot.slane %v1835_v18, 4  ;;  %3462 = vmatpush3.bf16.msra.mxu0 %v4116_v26  ;;  %v677_v49 = vshll.u32 %v4323_v39, 16  ;;  %v683_v16 = vshll.u32 %v4334_v11, 16  ;;  %5093 = vst [vmem:[#allocation8_spill] sm:$0xff] %v4362_v8  ;;  %5094 = vst [vmem:[#allocation9_spill] sm:$0xff] %v4364_v9 }
  0x68   : > { %v667_v46 = vrot.slane %v666_v34, 4  ;;  %v676_v58 = vrot.slane %v674_v43, 4  ;;  %3364 = vmatmul.mubr.msk.bf16.gmra.mrb[8].mxu1 %vm723_vm5, %v3080_v57  ;;  %v687_v1 = vshrl.u32 %v4334_v11, 16  ;;  %v693_v6 = vshll.u32 %v4338_v38, 16  ;;  %3653 = vmatprep.subr.msk.bf16.mxu0 %vm748_vm0, %v4329_v17 }
  0x69   : > { %v662_v53 = vsel %vm4076_vm6, %v657_v61, %v661_v25  ;;  %v1839_v62 = vsel %vm4261_vm9, %v1837_v20, %v1838_v15  ;;  %v679_v51 = vrot.slane %v677_v49, 5  ;;  %v685_v7 = vrot.slane %v683_v16, 5  ;;  %v4382_v20 = vld [vmem:[#allocation2 + $0x48] sm:$0xf] }
  0x6a   : > { %v672_v26 = vsel %vm4076_vm6, %v667_v46, %v671_v40  ;;  %v3177_v37 = vcombine.low %v1836_v13, %v1839_v62  ;;  %v689_v25 = vrot.slane %v687_v1, 4  ;;  %v3169_v60 = vrot.slane %v4194_v0, 9  ;;  %v4384_v46 = vld [vmem:[#allocation2 + $0x4c] sm:$0xf]  ;;  %v4394_v1 = vld [vmem:[#allocation2 + $0x54] sm:$0xf] }
  0x6b   : > { %v3081_v12 = vcombine.low %v662_v53, %v672_v26  ;;  %v680_v59 = vor.u32 %v679_v51, %v676_v58  ;;  %v1842_v10 = vrot.slane %v4208_v14, 5  ;;  %v1845_v19 = vrot.slane %v4220_v27, 5  ;;  %v4386_v58 = vld [vmem:[#allocation2 + $0x50] sm:$0x1]  ;;  %5095 = vst [vmem:[#allocation10_spill] sm:$0xff] %v4394_v1 }
  0x6c   : > { %3449 = vmatprep.mubr.msk.bf16.mxu0 %vm723_vm5, %v3177_v37  ;;  %v3170_v18 = vrot.slane %v4356_v21, 9  ;;  %v690_v15 = vor.u32 %v689_v25, %v685_v7  ;;  %v695_v41 = vrot.slane %v693_v6, 5  ;;  %v1849_v34 = vrot.slane %v4362_v8, 5  ;;  %v4396_v6 = vld [vmem:[#allocation2 + $0x58] sm:$0xf] }
  0x6d   : > { %3367 = vmatprep.mubr.msk.bf16.mxu1 %vm723_vm5, %v3081_v12  ;;  %v1852_v40 = vrot.slane %v4364_v9, 5  ;;  %v681_v43 = vrot.slane %v680_v59, 4  ;;  %v1843_v0 = vsel %vm4261_vm9, %v3169_v60, %v1842_v10  ;;  %v1844_v48 = vrot.slane %v1842_v10, 4  ;;  %5096 = vst [vmem:[#allocation11_spill] sm:$0xff] %v4396_v6  ;;  %v4398_v51 = vld [vmem:[#allocation2 + $0x5c] sm:$0x1] }
  0x6e   : > { %v691_v57 = vrot.slane %v690_v15, 4  ;;  %v1850_v14 = vsel %vm4261_vm9, %v3170_v18, %v1849_v34  ;;  %v1851_v27 = vrot.slane %v1849_v34, 4  ;;  %v3091_v53 = vcombine.low %v4041_v30, %v4043_v31  ;;  %5097 = vst [vmem:[#allocation12_spill] sm:$0xff] %v4398_v51  ;;  %v4408_v10 = vld [vmem:[#allocation2 + $0x64] sm:$0xf] }
  0x6f   : > { %v686_v61 = vsel %vm4076_vm6, %v681_v43, %v685_v7  ;;  %v1846_v13 = vsel %vm4261_vm9, %v1844_v48, %v1845_v19  ;;  %v3171_v7 = vrot.slane %v4382_v20, 9  ;;  %v1856_v12 = vrot.slane %v4384_v46, 5  ;;  %5098 = vst [vmem:[#allocation13_spill] sm:$0xff] %v4408_v10  ;;  %v4416_v34 = vld [vmem:[#allocation2 + $0x68] sm:$0x1] }
  0x70   : > { %v696_v49 = vsel %vm4076_vm6, %v691_v57, %v695_v41  ;;  %v3178_v16 = vcombine.low %v1843_v0, %v1846_v13  ;;  %v1853_v62 = vsel %vm4261_vm9, %v1851_v27, %v1852_v40  ;;  %v1859_v25 = vrot.slane %v4386_v58, 5  ;;  %v4414_v41 = vld [vmem:[#allocation2 + $0x60] sm:$0xf]  ;;  %5100 = vst [vmem:[#allocation15_spill] sm:$0xff] %v4416_v34  ;;  %v4625_v9 = vld [vmem:[#allocation2 + $0x2c] sm:$0x1] }
  0x71   : > { %v3082_v26 = vcombine.low %v686_v61, %v696_v49  ;;  %v3179_v37 = vcombine.low %v1850_v14, %v1853_v62  ;;  %v3172_v60 = vrot.slane %v4394_v1, 9  ;;  %v1863_v59 = vrot.slane %v4396_v6, 5  ;;  %5099 = vst [vmem:[#allocation14_spill] sm:$0xff] %v4414_v41 }
  0x72   : > { %3450 = vmatmul.mubr.msk.bf16.gmra.mrb[4].mxu0 %vm723_vm5, %v3178_v16  ;;  %v1857_v19 = vsel %vm4261_vm9, %v3171_v7, %v1856_v12  ;;  %v1858_v18 = vrot.slane %v1856_v12, 4  ;;  %v1866_v15 = vrot.slane %v4398_v51, 5  ;;  %v3092_v0 = vcombine.low %v4070_v54, %v4072_v55 }
  0x73   : > { %3368 = vmatmul.mubr.msk.bf16.gmra.mrb[12].mxu1 %vm723_vm5, %v3082_v26  ;;  %3453 = vmatprep.mubr.msk.bf16.mxu0 %vm723_vm5, %v3179_v37  ;;  %v1864_v40 = vsel %vm4261_vm9, %v3172_v60, %v1863_v59  ;;  %v1865_v43 = vrot.slane %v1863_v59, 4  ;;  %v1870_v57 = vrot.slane %v4408_v10, 5  ;;  %v3173_v61 = vrot.slane %v4414_v41, 9  ;;  %v3132_v26 = vld [vmem:[%s5058_s3 + $0xc] sm:$0xf] }
  0x74   : > { %3373 = vmatprep.mubr.msk.bf16.mxu1 %vm723_vm5, %v3091_v53  ;;  %v1860_v48 = vsel %vm4261_vm9, %v1858_v18, %v1859_v25  ;;  %v1873_v13 = vrot.slane %v4416_v34, 5  ;;  %v3093_v49 = vcombine.low %v4123_v42, %v4132_v47  ;;  %v1131_v62 = vsel %vm748_vm0, %v4150_v4, 0  ;;  %v4445_v4 = vld [vmem:[#allocation2 + $0x18] sm:$0xf]  ;;  %v4447_v25 = vld [vmem:[#allocation2 + $0x1c] sm:$0xf] }
  0x75   : > { %v3180_v14 = vcombine.low %v1857_v19, %v1860_v48  ;;  %v1867_v27 = vsel %vm4261_vm9, %v1865_v43, %v1866_v15  ;;  %v1872_v53 = vrot.slane %v1870_v57, 4  ;;  %v1033_v37 = vrot.slane %v4072_v55, 5  ;;  %v4582_v34 = vld [vmem:[#allocation2 + $0x58] sm:$0xf] }
  0x76   : > { %v3181_v16 = vcombine.low %v1864_v40, %v1867_v27  ;;  %v1871_v7 = vsel %vm4261_vm9, %v3173_v61, %v1870_v57  ;;  %v1036_v60 = vrot.slane %v4087_v2, 5  ;;  %v3094_v59 = vcombine.low %v4167_v29, %v4185_v45  ;;  %v4473_v57 = vld [vmem:[#allocation2 + $0x24] sm:$0xf] }
  0x77   : > { %v1874_v12 = vsel %vm4261_vm9, %v1872_v53, %v1873_v13  ;;  %v3192_v19 = vcombine.low %v4445_v4, %v4447_v25  ;;  %v3108_v18 = vrot.slane %v4070_v54, 9  ;;  %v1035_v15 = vrot.slane %v1033_v37, 4  ;;  %5101 = vst [vmem:[#allocation16_spill] sm:$0xff] %v4473_v57 }
  0x78   : > { %v3182_v55 = vcombine.low %v1871_v7, %v1874_v12  ;;  %v3095_v40 = vcombine.low %v4223_v28, %v4228_v36  ;;  %v2491_v43 = vsel %vm748_vm0, %v4329_v17, 0  ;;  %v4469_v48 = vsel %vm748_vm0, %v3132_v26, 0  ;;  %v4500_v7 = vld [vmem:[#allocation2 + $0x34] sm:$0xf]  ;;  %v4561_v17 = vld [vmem:[#allocation2 + $0x48] sm:$0xf] }
  0x79   : > { %v4462_v2 = vsel %vm4261_vm9, %v3108_v18, %v1033_v37  ;;  %v3109_v54 = vrot.slane %v4123_v42, 9  ;;  %v1040_v27 = vrot.slane %v4132_v47, 5  ;;  %v1043_v61 = vrot.slane %v4138_v52, 5  ;;  %v4498_v37 = vld [vmem:[#allocation2 + $0x30] sm:$0xf]  ;;  %5103 = vst [vmem:[#allocation18_spill] sm:$0xff] %v4561_v17 }
  0x7a   : > { %3454 = vmatmul.mubr.msk.bf16.gmra.mrb[8].mxu0 %vm723_vm5, %v3180_v14  ;;  %v4475_v14 = vld [vmem:[#allocation2 + $0x28] sm:$0xf]  ;;  %v1029_v13 = vrot.slane %v4045_v32, 5  ;;  %v2249_v42 = vshrl.u32 %v4445_v4, 16  ;;  %v3110_v52 = vrot.slane %v4167_v29, 9  ;;  %v1047_v32 = vrot.slane %v4185_v45, 5 }
  0x7b   : > { %3374 = vmatmul.mubr.msk.bf16.vlgmr.msra.gmra.mrb[0].mxu1 %vm723_vm5, %v3092_v0  ;;  %3457 = vmatprep.mubr.msk.bf16.mxu0 %vm723_vm5, %v3181_v16  ;;  %v4466_v0 = vsel %vm4261_vm9, %v1035_v15, %v1036_v60  ;;  %v4490_v53 = vsel %vm4261_vm9, %v3109_v54, %v1040_v27  ;;  %v1042_v47 = vrot.slane %v1040_v27, 4  ;;  %5102 = vst [vmem:[#allocation17_spill] sm:$0xff] %v4498_v37  ;;  %v1026_v12 = vrot.slane %v4043_v31, 5 }
  0x7c   : > { %3390 = vmatpush3.bf16.msra.mxu1 %v1131_v62  ;;  %3377 = vmatprep.mubr.msk.bf16.mxu1 %vm723_vm5, %v3093_v49  ;;  %v2252_v49 = vshll.u32 %v4445_v4, 16  ;;  %v3096_v62 = vcombine.low %v4247_v22, %v4255_v35  ;;  %v1050_v60 = vrot.slane %v4187_v50, 5  ;;  %v4511_v45 = vsel %vm4261_vm9, %v3110_v52, %v1047_v32 }
  0x7d   : > { %3648 = vmatprep.subr.msk.bf16.mxu1 %vm748_vm0, %v3132_v26  ;;  %v3193_v26 = vcombine.low %v4473_v57, %v4475_v14  ;;  %v4507_v29 = vsel %vm4261_vm9, %v1042_v47, %v1043_v61  ;;  %v3111_v18 = vrot.slane %v4223_v28, 9  ;;  %v1054_v31 = vrot.slane %v4228_v36, 5  ;;  %v4536_v47 = vld [vmem:[%s5058_s3 + $0x20] sm:$0xf] }
  0x7e   : > { %v1057_v50 = vrot.slane %v4239_v5, 5  ;;  %v3097_v15 = vcombine.low %v4291_v24, %v4297_v33  ;;  %v3107_v54 = vrot.slane %v4041_v30, 9  ;;  %v1028_v61 = vrot.slane %v1026_v12, 4 }
  0x7f   : > { %v4531_v36 = vsel %vm4261_vm9, %v3111_v18, %v1054_v31  ;;  %v1056_v5 = vrot.slane %v1054_v31, 4  ;;  %v2276_v30 = vshll.u32 %v4473_v57, 16  ;;  %v2286_v52 = vshrl.u32 %v4475_v14, 16  ;;  %v4546_v18 = vld [vmem:[#allocation2 + $0x40] sm:$0xf] }
  0x80   : > { %v1061_v28 = vrot.slane %v4255_v35, 5  ;;  %v4613_v35 = vld [vmem:[#allocation2 + $0x64] sm:$0xf]  ;;  %v2292_v8 = vshll.u32 %v4625_v9, 16 }
  0x81   : > { %v4550_v31 = vsel %vm4261_vm9, %v1056_v5, %v1057_v50  ;;  %v4563_v50 = vld [vmem:[#allocation2 + $0x4c] sm:$0xf]  ;;  %5107 = vst [vmem:[#allocation21_spill] sm:$0xff] %v4613_v35 }
  0x82   : > { %3458 = vmatmul.mubr.msk.bf16.gmra.mrb[12].mxu0 %vm723_vm5, %v3182_v55  ;;  %v1063_v55 = vrot.slane %v1061_v28, 4 }
  0x83   : > { %3378 = vmatmul.mubr.msk.bf16.gmra.mrb[4].mxu1 %vm723_vm5, %v3094_v59  ;;  %3463 = vmatprep.mubr.msk.bf16.mxu0 %vm723_vm5, %v3192_v19  ;;  %v1049_v59 = vrot.slane %v1047_v32, 4  ;;  %v2297_v32 = vshrl.u32 %v4498_v37, 16  ;;  %v1064_v19 = vrot.slane %v4270_v63, 5  ;;  %v1027_v63 = vsel %vm4261_vm9, %v3107_v54, %v1026_v12 }
  0x84   : > { %3381 = vmatprep.mubr.msk.bf16.mxu1 %vm723_vm5, %v3095_v40  ;;  %v3194_v40 = vcombine.low %v4498_v37, %v4500_v7  ;;  %v2251_v12 = vrot.slane %v2249_v42, 4  ;;  %v2254_v54 = vrot.slane %v2252_v49, 5  ;;  %v2282_v42 = vshll.u32 %v4475_v14, 16 }
  0x85   : > { %v4525_v27 = vsel %vm4261_vm9, %v1049_v59, %v1050_v60  ;;  %v4542_v60 = vld [vmem:[#allocation2 + $0x3c] sm:$0xf]  ;;  %v3112_v59 = vrot.slane %v4247_v22, 9  ;;  %v2300_v22 = vshll.u32 %v4498_v37, 16  ;;  %v3113_v49 = vrot.slane %v4291_v24, 9 }
  0x86   : > { %v3195_v16 = vcombine.low %v4542_v60, %v4546_v18  ;;  %v4611_v24 = vld [vmem:[#allocation2 + $0x60] sm:$0xf]  ;;  %v2299_v6 = vrot.slane %v2297_v32, 4 }
  0x87   : > { %v4577_v5 = vsel %vm4261_vm9, %v3112_v59, %v1061_v28  ;;  %v5105_v59 = vshrl.u32 %v4447_v25, 16  ;;  %v4594_v28 = vsel %vm4261_vm9, %v1063_v55, %v1064_v19  ;;  %v2255_v55 = vor.u32 %v2254_v54, %v2251_v12  ;;  %5106 = vst [vmem:[#allocation20_spill] sm:$0xff] %v4611_v24 }
  0x88   : > { %v2278_v54 = vrot.slane %v2276_v30, 5  ;;  %v2302_v37 = vrot.slane %v2300_v22, 5  ;;  %v4637_v30 = vld [vmem:[#allocation2 + $0x38] sm:$0x1] }
  0x89   : > { %v2264_v41 = vrot.slane %v5105_v59, 4  ;;  %v1068_v59 = vrot.slane %v4297_v33, 5  ;;  %v5108_v33 = vshrl.u32 %v4473_v57, 16 }
  0x8a   : > { %3464 = vmatmul.mubr.msk.bf16.vlgmr.msra.gmra.mrb[0].mxu0 %vm723_vm5, %v3193_v26  ;;  %v2258_v26 = vshll.u32 %v4447_v25, 16  ;;  %v2303_v21 = vor.u32 %v2302_v37, %v2299_v6  ;;  %v5109_v6 = vcombine.low %v4462_v2, %v4466_v0 }
  0x8b   : > { %3382 = vmatmul.mubr.msk.bf16.gmra.mrb[8].mxu1 %vm723_vm5, %v3096_v62  ;;  %3480 = vmatpush3.bf16.msra.mxu0 %v2491_v43  ;;  %v2310_v43 = vshrl.u32 %v4500_v7, 16  ;;  %v3098_v62 = vcombine.low %v4323_v39, %v4334_v11  ;;  %v4620_v12 = vsel %vm4261_vm9, %v3113_v49, %v1068_v59  ;;  %v1075_v49 = vrot.slane %v4334_v11, 5 }
  0x8c   : > { %3385 = vmatprep.mubr.msk.bf16.mxu1 %vm723_vm5, %v3097_v15  ;;  %3467 = vmatprep.mubr.msk.bf16.mxu0 %vm723_vm5, %v3194_v40  ;;  %v1030_v15 = vsel %vm4261_vm9, %v1028_v61, %v1029_v13  ;;  %v4571_v40 = vld [vmem:[#allocation2 + $0x54] sm:$0xf]  ;;  %v3196_v13 = vcombine.low %v4561_v17, %v4563_v50  ;;  %v4586_v61 = vld [vmem:[#allocation2 + $0x20] sm:$0x1]  ;;  %v4588_v51 = vrot.slane %v2258_v26, 5  ;;  %v1078_v11 = vrot.slane %v4338_v38, 5 }
  0x8d   : > { %5104 = vst [vmem:[#allocation19_spill] sm:$0xff] %v4571_v40  ;;  %3654 = vmatprep.subr.msk.bf16.mxu0 %vm748_vm0, %v4536_v47  ;;  %v3116_v10 = vcombine.low %v1027_v63, %v1030_v15  ;;  %v3197_v1 = vcombine.low %v4571_v40, %v4582_v34  ;;  %v2268_v19 = vshll.u32 %v4586_v61, 16  ;;  %v1071_v63 = vrot.slane %v4299_v23, 5 }
  0x8e   : > { %v2306_v15 = vshll.u32 %v4500_v7, 16  ;;  %v2265_v26 = vor.u32 %v2264_v41, %v4588_v51  ;;  %v1070_v23 = vrot.slane %v1068_v59, 4  ;;  %v3198_v59 = vcombine.low %v4611_v24, %v4613_v35 }
  0x8f   : > { %v2312_v32 = vrot.slane %v2310_v43, 4  ;;  %v2270_v3 = vrot.slane %v2268_v19, 5  ;;  %v2330_v19 = vshll.u32 %v4546_v18, 16 }
  0x90   : > { %v4629_v41 = vsel %vm4261_vm9, %v1070_v23, %v1071_v63  ;;  %v2256_v63 = vrot.slane %v2255_v55, 4  ;;  %v4648_v23 = vld [vmem:[#allocation2 + $0x70] sm:$0xf]  ;;  %v2266_v57 = vrot.slane %v2265_v26, 4  ;;  %v2372_v26 = vshll.u32 %v4571_v40, 16 }
  0x92   : > { %3468 = vmatmul.mubr.msk.bf16.gmra.mrb[4].mxu0 %vm723_vm5, %v3195_v16  ;;  %v2275_v16 = vrot.slane %v5108_v33, 4  ;;  %v3114_v33 = vrot.slane %v4323_v39, 9  ;;  %v1077_v39 = vrot.slane %v1075_v49, 4  ;;  %v2261_v37 = vsel %vm4076_vm6, %v2256_v63, %v4588_v51 }
  0x93   : > { %3386 = vmatmul.mubr.msk.bf16.gmra.mrb[12].mxu1 %vm723_vm5, %v3098_v62  ;;  %3471 = vmatprep.mubr.msk.bf16.mxu0 %vm723_vm5, %v3196_v13  ;;  %v4623_v62 = vrot.slane %v2282_v42, 5  ;;  %v2288_v13 = vrot.slane %v2286_v52, 4  ;;  %v4639_v52 = vrot.slane %v2306_v15, 5  ;;  %v4641_v42 = vld [vmem:[#allocation2 + $0x6c] sm:$0xf]  ;;  %v2345_v15 = vshrl.u32 %v4561_v17, 16 }
  0x94   : > { %3391 = vmatprep.mubr.msk.bf16.mxu1 %vm723_vm5, %v3116_v10  ;;  %v4645_v22 = vsel %vm4261_vm9, %v3114_v33, %v1075_v49  ;;  %v2279_v10 = vor.u32 %v2278_v54, %v2275_v16  ;;  %v4655_v55 = vsel %vm4261_vm9, %v1077_v39, %v1078_v11  ;;  %v2316_v33 = vshll.u32 %v4637_v30, 16 }
  0x95   : > { %v2289_v43 = vor.u32 %v2288_v13, %v4623_v62  ;;  %v2313_v38 = vor.u32 %v2312_v32, %v4639_v52  ;;  %v2348_v16 = vshll.u32 %v4561_v17, 16  ;;  %v2358_v54 = vshrl.u32 %v4563_v50, 16 }
  0x96   : > { %v5110_v13 = vcombine.low %v4490_v53, %v4507_v29  ;;  %v2271_v2 = vsel %vm4076_vm6, %v2266_v57, %v2270_v3  ;;  %v2280_v0 = vrot.slane %v2279_v10, 4  ;;  %v2294_v49 = vrot.slane %v2292_v8, 5  ;;  %v3740_v53 = vld [vmem:[%s5058_s3 + $0x10] sm:$0xf]  ;;  %v4691_v57 = vld [vmem:[#allocation2 + $0x44] sm:$0x1] }
  0x97   : > { %v2290_v32 = vrot.slane %v2289_v43, 4  ;;  %v2304_v39 = vrot.slane %v2303_v21, 4  ;;  %v5111_v11 = vshrl.u32 %v4542_v60, 16  ;;  %v5112_v51 = vshll.u32 %v4542_v60, 16 }
  0x98   : > { %v2314_v29 = vrot.slane %v2313_v38, 4  ;;  %v2318_v3 = vrot.slane %v2316_v33, 5  ;;  %v4693_v8 = vrot.slane %v2330_v19, 5  ;;  %v5113_v21 = vshrl.u32 %v4546_v18, 16 }
  0x99   : > { %v2369_v63 = vshrl.u32 %v4571_v40, 16  ;;  %v3209_v43 = vcombine.low %v2261_v37, %v2271_v2  ;;  %v2360_v33 = vrot.slane %v2358_v54, 4  ;;  %v2285_v19 = vsel %vm4076_vm6, %v2280_v0, %v4623_v62  ;;  %v4737_v40 = vld [vmem:[#allocation2 + $0x5c] sm:$0x1] }
  0x9a   : > { %3472 = vmatmul.mubr.msk.bf16.gmra.mrb[8].mxu0 %vm723_vm5, %v3197_v1  ;;  %v3199_v1 = vcombine.low %v4641_v42, %v4648_v23  ;;  %v2336_v10 = vrot.slane %v5113_v21, 4  ;;  %v2295_v21 = vsel %vm4076_vm6, %v2290_v32, %v2294_v49  ;;  %v2340_v37 = vshll.u32 %v4691_v57, 16 }
  0x9b   : > { %3392 = vmatmul.mubr.msk.bf16.vlgmr.msra.gmra.mrb[0].mxu1 %vm723_vm5, %v5109_v6  ;;  %3475 = vmatprep.mubr.msk.bf16.mxu0 %vm723_vm5, %v3198_v59  ;;  %v2354_v59 = vshll.u32 %v4563_v50, 16  ;;  %v2323_v6 = vrot.slane %v5111_v11, 4  ;;  %v2347_v11 = vrot.slane %v2345_v15, 4  ;;  %v2309_v15 = vsel %vm4076_vm6, %v2304_v39, %v4639_v52 }
  0x9c   : > { %3408 = vmatpush3.bf16.msra.mxu1 %v4469_v48  ;;  %3395 = vmatprep.mubr.msk.bf16.mxu1 %vm723_vm5, %v5110_v13  ;;  %v2326_v48 = vrot.slane %v5112_v51, 5  ;;  %v4698_v13 = vld [vmem:[#allocation2 + $0x50] sm:$0x1]  ;;  %v2350_v51 = vrot.slane %v2348_v16, 5  ;;  %v2319_v16 = vsel %vm4076_vm6, %v2314_v29, %v2318_v3  ;;  %v2337_v54 = vor.u32 %v2336_v10, %v4693_v8 }
  0x9d   : > { %3650 = vmatprep.subr.msk.bf16.mxu1 %vm748_vm0, %v3740_v53  ;;  %v2382_v53 = vshrl.u32 %v4582_v34, 16  ;;  %v4702_v38 = vrot.slane %v2354_v59, 5  ;;  %v2364_v2 = vshll.u32 %v4698_v13, 16  ;;  %v2393_v62 = vshrl.u32 %v4611_v24, 16 }
  0x9e   : > { %v2327_v17 = vor.u32 %v2326_v48, %v2323_v6  ;;  %v2396_v0 = vshll.u32 %v4611_v24, 16  ;;  %v5114_v49 = vcombine.low %v4511_v45, %v4525_v27  ;;  %v2378_v52 = vshll.u32 %v4582_v34, 16 }
  0x9f   : > { %v2406_v59 = vshrl.u32 %v4613_v35, 16  ;;  %v5115_v32 = vcombine.low %v4531_v36, %v4550_v31  ;;  %v2721_v39 = vsel %vm748_vm0, %v4536_v47, 0  ;;  %v2361_v6 = vor.u32 %v2360_v33, %v4702_v38 }
  0xa0   : > { %v2402_v45 = vshll.u32 %v4613_v35, 16  ;;  %v3210_v27 = vcombine.low %v2285_v19, %v2295_v21  ;;  %v3211_v48 = vcombine.low %v2309_v15, %v2319_v16  ;;  %v2328_v29 = vrot.slane %v2327_v17, 4 }
  0xa1   : > { %v2342_v3 = vrot.slane %v2340_v37, 5  ;;  %v2338_v10 = vrot.slane %v2337_v54, 4  ;;  %v4735_v24 = vrot.slane %v2378_v52, 5  ;;  %v2384_v36 = vrot.slane %v2382_v53, 4 }
  0xa2   : > { %3476 = vmatmul.mubr.msk.bf16.gmra.mrb[12].mxu0 %vm723_vm5, %v3199_v1  ;;  %v2351_v1 = vor.u32 %v2350_v51, %v2347_v11  ;;  %v2371_v11 = vrot.slane %v2369_v63, 4  ;;  %v2374_v51 = vrot.slane %v2372_v26, 5  ;;  %v2395_v31 = vrot.slane %v2393_v62, 4  ;;  %v4745_v63 = vld [vmem:[#allocation2 + $0x68] sm:$0x1] }
  0xa3   : > { %3396 = vmatmul.mubr.msk.bf16.gmra.mrb[4].mxu1 %vm723_vm5, %v5114_v49  ;;  %3481 = vmatprep.mubr.msk.bf16.mxu0 %vm723_vm5, %v3209_v43  ;;  %v2366_v43 = vrot.slane %v2364_v2, 5  ;;  %v2398_v47 = vrot.slane %v2396_v0, 5  ;;  %v4739_v33 = vrot.slane %v2402_v45, 5  ;;  %v2408_v35 = vrot.slane %v2406_v59, 4 }
  0xa4   : > { %3399 = vmatprep.mubr.msk.bf16.mxu1 %vm723_vm5, %v5115_v32  ;;  %v2352_v49 = vrot.slane %v2351_v1, 4  ;;  %v2362_v32 = vrot.slane %v2361_v6, 4  ;;  %v1574_v19 = vshrl.u32 %v4382_v20, 16  ;;  %v2417_v17 = vshrl.u32 %v4641_v42, 16 }
  0xa5   : > { %v2420_v21 = vshll.u32 %v4641_v42, 16  ;;  %v2430_v26 = vshrl.u32 %v4648_v23, 16  ;;  %v2333_v53 = vsel %vm4076_vm6, %v2328_v29, %v4693_v8  ;;  %v2343_v37 = vsel %vm4076_vm6, %v2338_v10, %v2342_v3 }
  0xa6   : > { %v2375_v15 = vor.u32 %v2374_v51, %v2371_v11  ;;  %v2426_v16 = vshll.u32 %v4648_v23, 16  ;;  %v5116_v54 = vcombine.low %v4577_v5, %v4594_v28  ;;  %v2357_v2 = vsel %vm4076_vm6, %v2352_v49, %v4702_v38  ;;  %v4779_v11 = vld [vmem:[#allocation2 + $0x74] sm:$0x1]  ;;  %v3742_v51 = vld [vmem:[#allocation2 + $0x10] sm:$0xf] }
  0xa7   : > { %v2385_v62 = vor.u32 %v2384_v36, %v4735_v24  ;;  %v2388_v8 = vshll.u32 %v4737_v40, 16  ;;  %v3138_v0 = vcombine.low %v4382_v20, %v4384_v46  ;;  %v5117_v1 = vcombine.low %v4620_v12, %v4629_v41 }
  0xa8   : > { %v2367_v5 = vsel %vm4076_vm6, %v2362_v32, %v2366_v43  ;;  %v2399_v28 = vor.u32 %v2398_v47, %v2395_v31  ;;  %v2409_v38 = vor.u32 %v2408_v35, %v4739_v33  ;;  %v2412_v52 = vshll.u32 %v4745_v63, 16  ;;  %v3741_v35 = vld [vmem:[#allocation2 + $0xc] sm:$0xf] }
  0xa9   : > { %v1577_v59 = vshll.u32 %v4382_v20, 16  ;;  %v2419_v6 = vrot.slane %v2417_v17, 4  ;;  %v2422_v45 = vrot.slane %v2420_v21, 5  ;;  %v1587_v12 = vshrl.u32 %v4384_v46, 16 }
  0xaa   : > { %3482 = vmatmul.mubr.msk.bf16.vlgmr.msra.gmra.mrb[0].mxu0 %vm723_vm5, %v3210_v27  ;;  %v3212_v41 = vcombine.low %v2333_v53, %v2343_v37  ;;  %v4777_v27 = vrot.slane %v2426_v16, 5  ;;  %v3213_v29 = vcombine.low %v2357_v2, %v2367_v5  ;;  %v2376_v3 = vrot.slane %v2375_v15, 4 }
  0xab   : > { %3400 = vmatmul.mubr.msk.bf16.gmra.mrb[8].mxu1 %vm723_vm5, %v5116_v54  ;;  %3498 = vmatpush3.bf16.msra.mxu0 %v2721_v39  ;;  %v1583_v39 = vshll.u32 %v4384_v46, 16  ;;  %v2386_v10 = vrot.slane %v2385_v62, 4  ;;  %v2390_v43 = vrot.slane %v2388_v8, 5  ;;  %v3133_v49 = vcombine.low %v3741_v35, %v3742_v51 }
  0xac   : > { %3403 = vmatprep.mubr.msk.bf16.mxu1 %vm723_vm5, %v5117_v1  ;;  %3485 = vmatprep.mubr.msk.bf16.mxu0 %vm723_vm5, %v3211_v48  ;;  %v2432_v48 = vrot.slane %v2430_v26, 4  ;;  %v2400_v36 = vrot.slane %v2399_v28, 4  ;;  %v2410_v31 = vrot.slane %v2409_v38, 4  ;;  %v2414_v32 = vrot.slane %v2412_v52, 5  ;;  %v3743_v52 = vld [vmem:[#allocation2 + $0x18] sm:$0xf] }
  0xad   : > { %v2423_v47 = vor.u32 %v2422_v45, %v2419_v6  ;;  %v2616_v17 = vrot.slane %v4447_v25, 5  ;;  %v1576_v21 = vrot.slane %v1574_v19, 4  ;;  %v2436_v53 = vshll.u32 %v4779_v11, 16  ;;  %v3745_v45 = vld [vmem:[#allocation2 + $0x24] sm:$0xf] }
  0xae   : > { %v2433_v26 = vor.u32 %v2432_v48, %v4777_v27  ;;  %v1579_v37 = vrot.slane %v1577_v59, 5  ;;  %v1585_v15 = vrot.slane %v1583_v39, 5  ;;  %v5118_v16 = vcombine.low %v4645_v22, %v4655_v55 }
  0xaf   : > { %v2381_v25 = vsel %vm4076_vm6, %v2376_v3, %v4735_v24  ;;  %v2391_v19 = vsel %vm4076_vm6, %v2386_v10, %v2390_v43  ;;  %v1589_v54 = vrot.slane %v1587_v12, 4  ;;  %v1593_v2 = vshll.u32 %v4386_v58, 16  ;;  %v3744_v58 = vld [vmem:[#allocation2 + $0x1c] sm:$0xf]  ;;  %v3746_v12 = vld [vmem:[#allocation2 + $0x28] sm:$0xf] }
  0xb0   : > { %v2405_v22 = vsel %vm4076_vm6, %v2400_v36, %v4739_v33  ;;  %v2415_v55 = vsel %vm4076_vm6, %v2410_v31, %v2414_v32  ;;  %v2424_v62 = vrot.slane %v2423_v47, 4  ;;  %v3225_v8 = vrot.slane %v4445_v4, 9  ;;  %v5120_v31 = vld [vmem:[#allocation8_spill] sm:$0xff]  ;;  %v5121_v47 = vld [vmem:[#allocation6_spill] sm:$0xff] }
  0xb1   : > { %v2618_v1 = vrot.slane %v2616_v17, 4  ;;  %v2619_v24 = vrot.slane %v4586_v61, 5  ;;  %v3214_v5 = vcombine.low %v2381_v25, %v2391_v19  ;;  %v2434_v28 = vrot.slane %v2433_v26, 4  ;;  %v5122_v26 = vld [vmem:[#allocation16_spill] sm:$0xff] }
  0xb2   : > { %3486 = vmatmul.mubr.msk.bf16.gmra.mrb[4].mxu0 %vm723_vm5, %v3212_v41  ;;  %v2438_v38 = vrot.slane %v2436_v53, 5  ;;  %v3134_v59 = vcombine.low %v3743_v52, %v3744_v58  ;;  %v3215_v39 = vcombine.low %v2405_v22, %v2415_v55  ;;  %v1595_v6 = vrot.slane %v1593_v2, 5 }
  0xb3   : > { %3404 = vmatmul.mubr.msk.bf16.gmra.mrb[12].mxu1 %vm723_vm5, %v5118_v16  ;;  %3489 = vmatprep.mubr.msk.bf16.mxu0 %vm723_vm5, %v3213_v29  ;;  %v3135_v33 = vcombine.low %v3745_v45, %v3746_v12  ;;  %v1580_v41 = vor.u32 %v1579_v37, %v1576_v21  ;;  %v1590_v48 = vor.u32 %v1589_v54, %v1585_v15  ;;  %v2623_v3 = vrot.slane %v4475_v14, 5  ;;  %v5123_v54 = vld [vmem:[#allocation17_spill] sm:$0xff] }
  0xb4   : > { %3409 = vmatprep.mubr.msk.bf16.mxu1 %vm723_vm5, %v3133_v49  ;;  %v2429_v4 = vsel %vm4076_vm6, %v2424_v62, %v4777_v27  ;;  %v2617_v61 = vsel %vm4261_vm9, %v3225_v8, %v2616_v17  ;;  %v2620_v29 = vsel %vm4261_vm9, %v2618_v1, %v2619_v24  ;;  %v2439_v10 = vsel %vm4076_vm6, %v2434_v28, %v2438_v38  ;;  %v5119_v27 = vld [vmem:[#allocation7_spill] sm:$0xff]  ;;  %v3747_v17 = vld [vmem:[#allocation2 + $0x30] sm:$0xf] }
  0xb5   : > { %v2630_v43 = vrot.slane %v4500_v7, 5  ;;  %v1581_v35 = vrot.slane %v1580_v41, 4  ;;  %v1591_v51 = vrot.slane %v1590_v48, 4  ;;  %v1550_v49 = vshrl.u32 %v5119_v27, 16  ;;  %v3748_v7 = vld [vmem:[#allocation2 + $0x34] sm:$0xf] }
  0xb6   : > { %v1553_v36 = vshll.u32 %v5119_v27, 16  ;;  %v1559_v32 = vshll.u32 %v5120_v31, 16  ;;  %v1563_v14 = vshrl.u32 %v5120_v31, 16  ;;  %v3136_v21 = vcombine.low %v3747_v17, %v3748_v7 }
  0xb7   : > { %v3226_v53 = vrot.slane %v5122_v26, 9  ;;  %v1586_v37 = vsel %vm4076_vm6, %v1581_v35, %v1585_v15  ;;  %v1596_v16 = vsel %vm4076_vm6, %v1591_v51, %v1595_v6  ;;  %v2625_v25 = vrot.slane %v2623_v3, 4 }
  0xb8   : > { %v2626_v19 = vrot.slane %v4625_v9, 5  ;;  %v3227_v2 = vrot.slane %v5123_v54, 9  ;;  %v4831_v22 = vcombine.low %v1586_v37, %v1596_v16  ;;  %v3216_v55 = vcombine.low %v2429_v4, %v2439_v10  ;;  %v5125_v4 = vld [vmem:[#allocation10_spill] sm:$0xff] }
  0xb9   : > { %v3234_v62 = vcombine.low %v2617_v61, %v2620_v29  ;;  %v2632_v8 = vrot.slane %v2630_v43, 4  ;;  %v2633_v1 = vrot.slane %v4637_v30, 5  ;;  %v1552_v24 = vrot.slane %v1550_v49, 4  ;;  %v5127_v49 = vld [vmem:[#allocation18_spill] sm:$0xff] }
  0xba   : > { %3490 = vmatmul.mubr.msk.bf16.gmra.mrb[8].mxu0 %vm723_vm5, %v3214_v5  ;;  %v1555_v5 = vrot.slane %v1553_v36, 5  ;;  %v1561_v28 = vrot.slane %v1559_v32, 5  ;;  %v1565_v38 = vrot.slane %v1563_v14, 4  ;;  %v3137_v15 = vcombine.low %v5119_v27, %v5120_v31  ;;  %v5128_v14 = vld [vmem:[#allocation13_spill] sm:$0xff] }
  0xbb   : > { %3410 = vmatmul.mubr.msk.bf16.vlgmr.msra.gmra.mrb[0].mxu1 %vm723_vm5, %v3134_v59  ;;  %3493 = vmatprep.mubr.msk.bf16.mxu0 %vm723_vm5, %v3215_v39  ;;  %v2624_v52 = vsel %vm4261_vm9, %v3226_v53, %v2623_v3  ;;  %v2627_v9 = vsel %vm4261_vm9, %v2625_v25, %v2626_v19  ;;  %v2631_v58 = vsel %vm4261_vm9, %v3227_v2, %v2630_v43  ;;  %v2637_v30 = vrot.slane %v4546_v18, 5  ;;  %v5124_v59 = vld [vmem:[#allocation9_spill] sm:$0xff]  ;;  %v5126_v3 = vld [vmem:[#allocation11_spill] sm:$0xff] }
  0xbc   : > { %3516 = vmatpush3.bf16.msra.mxu1 %v5121_v47  ;;  %3413 = vmatprep.mubr.msk.bf16.mxu1 %vm723_vm5, %v3135_v33  ;;  %v1569_v39 = vshll.u32 %v5124_v59, 16  ;;  %v2634_v6 = vsel %vm4261_vm9, %v2632_v8, %v2633_v1  ;;  %v1556_v45 = vor.u32 %v1555_v5, %v1552_v24  ;;  %v1566_v12 = vor.u32 %v1565_v38, %v1561_v28  ;;  %v5129_v47 = vld [vmem:[#allocation14_spill] sm:$0xff]  ;;  %v5131_v5 = vld [vmem:[#allocation12_spill] sm:$0xff] }
  0xbd   : > { %v2644_v33 = vrot.slane %v4563_v50, 5  ;;  %v3235_v41 = vcombine.low %v2624_v52, %v2627_v9  ;;  %v3228_v48 = vrot.slane %v4542_v60, 9  ;;  %v2640_v18 = vrot.slane %v4691_v57, 5  ;;  %v5133_v59 = vld [vmem:[#allocation20_spill] sm:$0xff] }
  0xbe   : > { %v1598_v61 = vshrl.u32 %v5125_v4, 16  ;;  %v1601_v29 = vshll.u32 %v5125_v4, 16  ;;  %v1607_v10 = vshll.u32 %v5126_v3, 16  ;;  %v1611_v43 = vshrl.u32 %v5126_v3, 16 }
  0xbf   : > { %v3236_v35 = vcombine.low %v2631_v58, %v2634_v6  ;;  %v2639_v51 = vrot.slane %v2637_v30, 4  ;;  %v1571_v27 = vrot.slane %v1569_v39, 5  ;;  %v3229_v50 = vrot.slane %v5127_v49, 9 }
  0xc0   : > { %v1557_v36 = vrot.slane %v1556_v45, 4  ;;  %v1567_v31 = vrot.slane %v1566_v12, 4  ;;  %v2646_v32 = vrot.slane %v2644_v33, 4  ;;  %v2647_v60 = vrot.slane %v4698_v13, 5 }
  0xc1   : > { %v3139_v57 = vcombine.low %v5125_v4, %v5126_v3  ;;  %v3140_v17 = vcombine.low %v5129_v47, %v5128_v14  ;;  %v1600_v7 = vrot.slane %v1598_v61, 4  ;;  %v1609_v26 = vrot.slane %v1607_v10, 5 }
  0xc2   : > { %3494 = vmatmul.mubr.msk.bf16.gmra.mrb[12].mxu0 %vm723_vm5, %v3216_v55  ;;  %v1613_v53 = vrot.slane %v1611_v43, 4  ;;  %v2638_v37 = vsel %vm4261_vm9, %v3228_v48, %v2637_v30  ;;  %v2641_v16 = vsel %vm4261_vm9, %v2639_v51, %v2640_v18  ;;  %v2645_v13 = vsel %vm4261_vm9, %v3229_v50, %v2644_v33  ;;  %v5130_v55 = vld [vmem:[#allocation21_spill] sm:$0xff]  ;;  %v5134_v51 = vld [vmem:[#allocation15_spill] sm:$0xff] }
  0xc3   : > { %3414 = vmatmul.mubr.msk.bf16.gmra.mrb[4].mxu1 %vm723_vm5, %v3136_v21  ;;  %3499 = vmatprep.mubr.msk.bf16.mxu0 %vm723_vm5, %v3234_v62  ;;  %v1603_v21 = vrot.slane %v1601_v29, 5  ;;  %v2651_v25 = vrot.slane %v4582_v34, 5  ;;  %v1562_v19 = vsel %vm4076_vm6, %v1557_v36, %v1561_v28  ;;  %v1572_v54 = vsel %vm4076_vm6, %v1567_v31, %v1571_v27 }
  0xc4   : > { %3417 = vmatprep.mubr.msk.bf16.mxu1 %vm723_vm5, %v3137_v15  ;;  %v2648_v2 = vsel %vm4261_vm9, %v2646_v32, %v2647_v60  ;;  %v2658_v62 = vrot.slane %v5130_v55, 5  ;;  %v1622_v34 = vshrl.u32 %v5129_v47, 16  ;;  %v1625_v20 = vshll.u32 %v5129_v47, 16  ;;  %v5132_v15 = vld [vmem:[#allocation19_spill] sm:$0xff] }
  0xc5   : > { %v1631_v46 = vshll.u32 %v5128_v14, 16  ;;  %v3237_v8 = vcombine.low %v2638_v37, %v2641_v16  ;;  %v1604_v1 = vor.u32 %v1603_v21, %v1600_v7  ;;  %v1614_v24 = vor.u32 %v1613_v53, %v1609_v26 }
  0xc6   : > { %v1617_v28 = vshll.u32 %v5131_v5, 16  ;;  %v3238_v38 = vcombine.low %v2645_v13, %v2648_v2  ;;  %v3230_v52 = vrot.slane %v5132_v15, 9  ;;  %v2653_v9 = vrot.slane %v2651_v25, 4 }
  0xc7   : > { %v2654_v58 = vrot.slane %v4737_v40, 5  ;;  %v3154_v30 = vcombine.low %v1562_v19, %v1572_v54  ;;  %v3231_v39 = vrot.slane %v5133_v59, 9  ;;  %v2660_v6 = vrot.slane %v2658_v62, 4 }
  0xc8   : > { %v2661_v45 = vrot.slane %v4745_v63, 5  ;;  %v1624_v12 = vrot.slane %v1622_v34, 4  ;;  %v1627_v33 = vrot.slane %v1625_v20, 5  ;;  %v1605_v18 = vrot.slane %v1604_v1, 4  ;;  %v4937_v34 = vld [vmem:[%s5060_s5] ss:$0 sm:$0xff] }
  0xc9   : > { %v1615_v4 = vrot.slane %v1614_v24, 4  ;;  %v1619_v61 = vrot.slane %v1617_v28, 5  ;;  %v2652_v40 = vsel %vm4261_vm9, %v3230_v52, %v2651_v25  ;;  %v2655_v29 = vsel %vm4261_vm9, %v2653_v9, %v2654_v58 }
  0xca   : > { %3500 = vmatmul.mubr.msk.bf16.vlgmr.msra.gmra.mrb[0].mxu0 %vm723_vm5, %v3235_v41  ;;  %v1633_v41 = vrot.slane %v1631_v46, 5  ;;  %v2659_v63 = vsel %vm4261_vm9, %v3231_v39, %v2658_v62  ;;  %v2665_v3 = vrot.slane %v4648_v23, 5  ;;  %v2662_v10 = vsel %vm4261_vm9, %v2660_v6, %v2661_v45 }
  0xcb   : > { %3418 = vmatmul.mubr.msk.bf16.gmra.mrb[8].mxu1 %vm723_vm5, %v3138_v0  ;;  %3503 = vmatprep.mubr.msk.bf16.mxu0 %vm723_vm5, %v3236_v35  ;;  %v1635_v0 = vshrl.u32 %v5128_v14, 16  ;;  %v1628_v43 = vor.u32 %v1627_v33, %v1624_v12  ;;  %v1641_v27 = vshll.u32 %v5134_v51, 16  ;;  %v1610_v49 = vsel %vm4076_vm6, %v1605_v18, %v1609_v26 }
  0xcc   : > { %3421 = vmatprep.mubr.msk.bf16.mxu1 %vm723_vm5, %v3139_v57  ;;  %v1620_v50 = vsel %vm4076_vm6, %v1615_v4, %v1619_v61  ;;  %v3239_v36 = vcombine.low %v2652_v40, %v2655_v29  ;;  %v3240_v31 = vcombine.low %v2659_v63, %v2662_v10  ;;  %v3232_v32 = vrot.slane %v4641_v42, 9 }
  0xcd   : > { %v1637_v48 = vrot.slane %v1635_v0, 4  ;;  %v2667_v23 = vrot.slane %v2665_v3, 4  ;;  %v2668_v60 = vrot.slane %v4779_v11, 5  ;;  %v3156_v57 = vcombine.low %v1610_v49, %v1620_v50 }
  0xce   : > { %v1629_v14 = vrot.slane %v1628_v43, 4  ;;  %v2666_v7 = vsel %vm4261_vm9, %v3232_v32, %v2665_v3 }
  0xcf   : > { %v1638_v35 = vor.u32 %v1637_v48, %v1633_v41  ;;  %v2669_v42 = vsel %vm4261_vm9, %v2667_v23, %v2668_v60 }
  0xd0   : > { %v1634_v11 = vsel %vm4076_vm6, %v1629_v14, %v1633_v41  ;;  %v3241_v26 = vcombine.low %v2666_v7, %v2669_v42 }
  0xd1   : > { %v1639_v47 = vrot.slane %v1638_v35, 4 }
  0xd2   : > { %3504 = vmatmul.mubr.msk.bf16.gmra.mrb[4].mxu0 %vm723_vm5, %v3237_v8 }
  0xd3   : > { %3422 = vmatmul.mubr.msk.bf16.gmra.mrb[12].mxu1 %vm723_vm5, %v3140_v17  ;;  %3507 = vmatprep.mubr.msk.bf16.mxu0 %vm723_vm5, %v3238_v38  ;;  %v1643_v17 = vrot.slane %v1641_v27, 5 }
  0xd4   : > { %3435 = vmatprep.mubr.msk.bf16.mxu1 %vm723_vm5, %v3154_v30 }
  0xd5   : > { %v1644_v21 = vsel %vm4076_vm6, %v1639_v47, %v1643_v17 }
  0xd6   : > { %v3157_v53 = vcombine.low %v1634_v11, %v1644_v21 }
  0xda   : > { %3508 = vmatmul.mubr.msk.bf16.gmra.mrb[8].mxu0 %vm723_vm5, %v3239_v36 }
  0xdb   : > { %3436 = vmatmul.mubr.msk.bf16.vlgmr.msra.gmra.mrb[8].mxu1 %vm723_vm5, %v4831_v22  ;;  %3511 = vmatprep.mubr.msk.bf16.mxu0 %vm723_vm5, %v3240_v31 }
  0xdc   : > { %3439 = vmatprep.mubr.msk.bf16.mxu1 %vm723_vm5, %v3156_v57 }
  0xe2   : > { %3512 = vmatmul.mubr.msk.bf16.gmra.mrb[12].mxu0 %vm723_vm5, %v3241_v26 }
  0xe3   : > { %3440 = vmatmul.mubr.msk.bf16.gmra.mrb[12].mxu1 %vm723_vm5, %v3157_v53 }
 0x18e   : > { %v3411_v22 = vpop.f32.mrb[0].mxu1 }
 0x18f   : > { %v1374_v37 = vpop.f32.mrb[1].mxu1 }
 0x190   : > { %v3412_v44 = vpop.f32.mrb[2].mxu1 }
 0x191   : > { %v1377_v16 = vpop.f32.mrb[3].mxu1 }
 0x196   : > { %v3415_v13 = vpop.f32.mrb[4].mxu1 }
 0x197   : > { %v1390_v25 = vpop.f32.mrb[5].mxu1 }
 0x198   : > { %v3416_v19 = vpop.f32.mrb[6].mxu1 }
 0x199   : > { %v1393_v54 = vpop.f32.mrb[7].mxu1 }
 0x19d   : > { %v3501_v2 = vpop.f32.mrb[0].mxu0 }
 0x19e   : > { %v3517_v55 = vadd.f32 %v3501_v2, %v3411_v22  ;;  %v2757_v62 = vpop.f32.mrb[1].mxu0 }
 0x19f   : > { %v3518_v20 = vadd.f32 %v2757_v62, %v1374_v37  ;;  %v3502_v46 = vpop.f32.mrb[2].mxu0 }
 0x1a0   : > { %v2845_v0 = vmul.f32 %v3517_v55, %v4932_v56  ;;  %v3519_v8 = vadd.f32 %v3502_v46, %v3412_v44  ;;  %v2760_v1 = vpop.f32.mrb[3].mxu0 }
 0x1a1   : > { %v2843_v24 = vmul.f32 %v3518_v20, %v4932_v56  ;;  %v3520_v5 = vadd.f32 %v2760_v1, %v1377_v16 }
 0x1a2   : > { %v2868_v28 = vadd.f32 %v4937_v34, %v2845_v0  ;;  %v2846_v38 = vmul.f32 %v3519_v8, %v4932_v56 }
 0x1a3   : > { %v2866_v15 = vadd.f32 %v4937_v34, %v2843_v24  ;;  %v2844_v52 = vmul.f32 %v3520_v5, %v4932_v56 }
 0x1a4   : > { %v2884_v9 = vmax.f32 %v2868_v28, 0.0  ;;  %v2869_v58 = vadd.f32 %v4937_v34, %v2846_v38 }
 0x1a5   : > { %v2882_v30 = vmax.f32 %v2866_v15, 0.0  ;;  %v2867_v59 = vadd.f32 %v4937_v34, %v2844_v52  ;;  %v3505_v39 = vpop.f32.mrb[4].mxu0 }
 0x1a6   : > { %2900 = vst [vmem:[%s4949_s13 + $0x10] sm:$0xff] %v2884_v9  ;;  %v2885_v6 = vmax.f32 %v2869_v58, 0.0  ;;  %v3521_v45 = vadd.f32 %v3505_v39, %v3415_v13  ;;  %v2773_v12 = vpop.f32.mrb[5].mxu0 }
 0x1a7   : > { %2898 = vst [vmem:[%s4949_s13] sm:$0xff] %v2882_v30  ;;  %v2883_v33 = vmax.f32 %v2867_v59, 0.0  ;;  %v3522_v41 = vadd.f32 %v2773_v12, %v1390_v25  ;;  %v3506_v48 = vpop.f32.mrb[6].mxu0 }
 0x1a8   : > { %2901 = vst [vmem:[%s4949_s13 + $0x18] sm:$0xff] %v2885_v6  ;;  %v2849_v18 = vmul.f32 %v3521_v45, %v4932_v56  ;;  %v3523_v4 = vadd.f32 %v3506_v48, %v3416_v19  ;;  %v2776_v61 = vpop.f32.mrb[7].mxu0 }
 0x1a9   : > { %2899 = vst [vmem:[%s4949_s13 + $0x8] sm:$0xff] %v2883_v33  ;;  %v2847_v40 = vmul.f32 %v3522_v41, %v4932_v56  ;;  %v3524_v29 = vadd.f32 %v2776_v61, %v1393_v54 }
 0x1aa   : > { %v2872_v63 = vadd.f32 %v4937_v34, %v2849_v18  ;;  %v2850_v3 = vmul.f32 %v3523_v4, %v4932_v56 }
 0x1ab   : > { %v2870_v10 = vadd.f32 %v4937_v34, %v2847_v40  ;;  %v2848_v43 = vmul.f32 %v3524_v29, %v4932_v56 }
 0x1ac   : > { %v2888_v35 = vmax.f32 %v2872_v63, 0.0  ;;  %v2873_v51 = vadd.f32 %v4937_v34, %v2850_v3 }
 0x1ad   : > { %v2886_v27 = vmax.f32 %v2870_v10, 0.0  ;;  %v2871_v49 = vadd.f32 %v4937_v34, %v2848_v43  ;;  %v3509_v50 = vpop.f32.mrb[8].mxu0 }
 0x1ae   : > { %2904 = vst [vmem:[%s4949_s13 + $0x30] sm:$0xff] %v2888_v35  ;;  %v2889_v36 = vmax.f32 %v2873_v51, 0.0  ;;  %v3437_v31 = vpop.f32.mrb[8].mxu1  ;;  %v2789_v32 = vpop.f32.mrb[9].mxu0 }
 0x1af   : > { %2902 = vst [vmem:[%s4949_s13 + $0x20] sm:$0xff] %v2886_v27  ;;  %v2887_v23 = vmax.f32 %v2871_v49, 0.0  ;;  %v3525_v60 = vadd.f32 %v3509_v50, %v3437_v31  ;;  %v1764_v57 = vpop.f32.mrb[9].mxu1  ;;  %v3510_v14 = vpop.f32.mrb[10].mxu0 }
 0x1b0   : > { %2905 = vst [vmem:[%s4949_s13 + $0x38] sm:$0xff] %v2889_v36  ;;  %v3526_v47 = vadd.f32 %v2789_v32, %v1764_v57  ;;  %v3438_v17 = vpop.f32.mrb[10].mxu1  ;;  %v2792_v7 = vpop.f32.mrb[11].mxu0 }
 0x1b1   : > { %2903 = vst [vmem:[%s4949_s13 + $0x28] sm:$0xff] %v2887_v23  ;;  %v2853_v42 = vmul.f32 %v3525_v60, %v4932_v56  ;;  %v3527_v11 = vadd.f32 %v3510_v14, %v3438_v17  ;;  %v1767_v21 = vpop.f32.mrb[11].mxu1 }
 0x1b2   : > { %v2851_v26 = vmul.f32 %v3526_v47, %v4932_v56  ;;  %v3528_v53 = vadd.f32 %v2792_v7, %v1767_v21 }
 0x1b3   : > { %v2876_v22 = vadd.f32 %v4937_v34, %v2853_v42  ;;  %v2854_v37 = vmul.f32 %v3527_v11, %v4932_v56 }
 0x1b4   : > { %v2874_v44 = vadd.f32 %v4937_v34, %v2851_v26  ;;  %v2852_v16 = vmul.f32 %v3528_v53, %v4932_v56 }
 0x1b5   : > { %v2892_v13 = vmax.f32 %v2876_v22, 0.0  ;;  %v2877_v25 = vadd.f32 %v4937_v34, %v2854_v37  ;;  %v3513_v19 = vpop.f32.mrb[12].mxu0 }
 0x1b6   : > { %v2890_v54 = vmax.f32 %v2874_v44, 0.0  ;;  %v2875_v2 = vadd.f32 %v4937_v34, %v2852_v16  ;;  %v3441_v55 = vpop.f32.mrb[12].mxu1  ;;  %v2805_v62 = vpop.f32.mrb[13].mxu0 }
 0x1b7   : > { %2908 = vst [vmem:[%s4949_s13 + $0x50] sm:$0xff] %v2892_v13  ;;  %v2893_v20 = vmax.f32 %v2877_v25, 0.0  ;;  %v3529_v46 = vadd.f32 %v3513_v19, %v3441_v55  ;;  %v1780_v0 = vpop.f32.mrb[13].mxu1  ;;  %v3514_v8 = vpop.f32.mrb[14].mxu0 }
 0x1b8   : > { %2906 = vst [vmem:[%s4949_s13 + $0x40] sm:$0xff] %v2890_v54  ;;  %v2891_v1 = vmax.f32 %v2875_v2, 0.0  ;;  %v3530_v24 = vadd.f32 %v2805_v62, %v1780_v0  ;;  %v3442_v5 = vpop.f32.mrb[14].mxu1  ;;  %v2808_v28 = vpop.f32.mrb[15].mxu0 }
 0x1b9   : > { %2909 = vst [vmem:[%s4949_s13 + $0x58] sm:$0xff] %v2893_v20  ;;  %v2857_v38 = vmul.f32 %v3529_v46, %v4932_v56  ;;  %v3531_v15 = vadd.f32 %v3514_v8, %v3442_v5  ;;  %v1783_v52 = vpop.f32.mrb[15].mxu1 }
 0x1ba   : > { %2907 = vst [vmem:[%s4949_s13 + $0x48] sm:$0xff] %v2891_v1  ;;  %v2855_v9 = vmul.f32 %v3530_v24, %v4932_v56  ;;  %v3532_v58 = vadd.f32 %v2808_v28, %v1783_v52 }
 0x1bb   : > { %v2880_v30 = vadd.f32 %v4937_v34, %v2857_v38  ;;  %v2858_v59 = vmul.f32 %v3531_v15, %v4932_v56 }
 0x1bc   : > { %v2878_v39 = vadd.f32 %v4937_v34, %v2855_v9  ;;  %v2856_v6 = vmul.f32 %v3532_v58, %v4932_v56 }
 0x1bd   : > { %v2896_v45 = vmax.f32 %v2880_v30, 0.0  ;;  %v2881_v12 = vadd.f32 %v4937_v34, %v2858_v59 }
 0x1be   : > { %v2894_v33 = vmax.f32 %v2878_v39, 0.0  ;;  %v2879_v41 = vadd.f32 %v4937_v34, %v2856_v6 }
 0x1bf   : > { %2912 = vst [vmem:[%s4949_s13 + $0x70] sm:$0xff] %v2896_v45  ;;  %v2897_v48 = vmax.f32 %v2881_v12, 0.0 }
 0x1c0   : > { %2910 = vst [vmem:[%s4949_s13 + $0x60] sm:$0xff] %v2894_v33  ;;  %v2895_v56 = vmax.f32 %v2879_v41, 0.0 }
 0x1c1   : > { %2913 = vst [vmem:[%s4949_s13 + $0x78] sm:$0xff] %v2897_v48 }
 0x1c2   : > { %2911 = vst [vmem:[%s4949_s13 + $0x68] sm:$0xff] %v2895_v56 }
 0x1c3   : > { %3762 = shalt.err (!%p3759_p10)
}
 0x1c4   : > { %s3763_s19 = scalar_lea.hbm %s4994_s9, 2048  ;;  %s3767_s25 = scalar_lea.hbm %s5061_s6, 8192 }
 0x1c5   : > { %p3764_p11 = scmp.ne.s32.totalorder %s4994_s9, %s3763_s19  ;;  %p3768_p0 = scmp.lt.u32.totalorder %s4994_s9, %s5061_s6 }
 0x1c6   : > { %p3769_p1 = scmp.lt.u32.totalorder %s3767_s25, %s3763_s19  ;;  %p3771_p4 = scmp.lt.u32.totalorder %s3763_s19, %s4994_s9 }
 0x1c7   : > { %p3765_p12 = pnand %p3764_p11, %p3934_p3 }
 0x1c8   : > { %p3770_p2 = por %p3769_p1, %p3768_p0 }
 0x1c9   : > { %p3766_p13 = pneg %p3765_p12 }
 0x1ca   : > { %p3772_p5 = por %p3771_p4, %p3770_p2 }
 0x1cc   : > { %p3773_p6 = pnand %p3772_p5, %p3766_p13 }
 0x1ce   : > { %3776 = shalt.err (!%p3773_p6)
}
 0x1cf   : > { %s3846_s20 = smov 128   ;;  %s3847_s29 = smov 8  }
 0x1d0   : > { %3659 = dma.vmem_to_hbm [thread:$0]  (%p3934_p3), %s4996_s18, 2048, %s4994_s9, %s5003_s12, %s3846_s20, %s3846_s20, %s3847_s29  }
 0x1d1 PF: > { %p3665_p7 = scmp.ge.s32.totalorder %s3843_s28, 2  ;;  %s2946_s14 = sand.u32 1, %s3815_s21  }
 0x1d2   : > { %s2947_s17 = scalar_lea.sflag [#allocation4], %s2946_s14 }
 0x1d3   : > { %p3662_p9 = pnand %p3665_p7, %p3943_p8 }
 0x1d5   : > { %3810 = dma.done.wait (!%p3662_p9), %s2947_s17, 2048  }
 0x1d6   : > { %3812 = vsyncadd (!%p3662_p9), %s2947_s17, 4294965248  ;;  %s19_s28 = sadd.s32 1, %s3843_s28   ;;  %s5135_s21 = smov %s3819_s22 }
 0x1d7   : > { %p16_p10 = scmp.ge.s32.totalorder %s19_s28, 6   ;;  %s5136_s22 = smov %s3823_s23 }
 0x1d8   : > { %s5137_s23 = smov %s3952_s15  ;;  %s5138_s24 = smov %s3835_s26 }
 0x1d9   : > { %s5139_s25 = smov %s3839_s27  ;;  %s5140_s26 = smov %s5143_s7 }
 0x1da   : > { %s5141_s27 = smov %s5147_s8  ;;  %18 = sbr.rel (!%p16_p10) target bundleno = 5 (0x5), region = 97 }
 0x1e1   :  { %2952 = vsyncpa [#allocation4], 1 }
 0x1e2   :  { %2954 = vsyncpa [#allocation4 + $0x1], 1 }

</bundles_post_ra>
